<compile_context>
chip_gen: v5e
topology: v5e:2x2
jax: 0.10.0
libtpu: 0.0.40
codegen_flags: <defaults>
</compile_context>

<pallas_src>
import functools

import numpy as np
import jax
import jax.numpy as jnp
from jax import lax
from jax.experimental import pallas as pl
from jax.experimental.pallas import tpu as pltpu


# --------------------------------------------------------------------------
# Kernel body
# --------------------------------------------------------------------------
def _take1(x, j, axis):
    """Static size-1 slice of a (bnc, H, W) value along axis 1 or 2."""
    if axis == 1:
        return x[:, j:j + 1, :]
    return x[:, :, j:j + 1]


def _reflect_conv_axis(x, taps, axis, size):
    """1-D K-tap correlation along `axis` with ReflectionPad2d semantics.

    Interior rows/cols: weighted sum of circular pltpu.roll's (XLU slot, no
    misaligned loads / per-tap VMEM copies).  The K//2 boundary rows/cols per
    side are recomputed exactly from reflected (static) indices and merged back
    with jnp.where.  `taps` are compile-time Python floats.
    """
    K = len(taps)
    p = K // 2

    acc = taps[p] * x
    for d in range(1, p + 1):
        # value at index i <- x[i - d]   (weight taps[p - d])
        acc = acc + taps[p - d] * pltpu.roll(x, shift=d, axis=axis)
        # value at index i <- x[i + d]   (weight taps[p + d])
        acc = acc + taps[p + d] * pltpu.roll(x, shift=(size - d) % size, axis=axis)
    if p == 0:
        return acc

    def reflect(j):  # ReflectionPad2d: no edge repeat
        if j < 0:
            return -j
        if j >= size:
            return 2 * size - 2 - j
        return j

    idx = lax.broadcasted_iota(jnp.int32, x.shape, axis)
    for h in tuple(range(p)) + tuple(range(size - p, size)):
        row = taps[0] * _take1(x, reflect(h - p), axis)
        for t in range(1, K):
            row = row + taps[t] * _take1(x, reflect(h - p + t), axis)
        acc = jnp.where(idx == h, row, acc)
    return acc


def _gaussian_kernel(x_ref, o_ref, *, taps, H, W):
    # x_ref / o_ref: (bnc, H, W) blocks of the fused-plane NCHW tensor.
    x = x_ref[...].astype(jnp.float32)
    y = _reflect_conv_axis(x, taps, axis=1, size=H)   # vertical pass
    z = _reflect_conv_axis(y, taps, axis=2, size=W)   # horizontal pass
    o_ref[...] = z.astype(o_ref.dtype)


# --------------------------------------------------------------------------
# Generation-aware tiling
# --------------------------------------------------------------------------
def _device_kind():
    try:
        return jax.devices()[0].device_kind.lower()
    except Exception:
        return ""


def _is_single_core_gen(kind):
    # v5e / v6e: 128 MiB VMEM, one TensorCore.  Anything else (v7x, unknown)
    # is treated as the conservative 64 MiB / two-TensorCore case.
    return ("v5" in kind) or ("v6" in kind)


def _pick_block_planes(nc, h, w):
    kind = _device_kind()
    single_core = _is_single_core_gen(kind)
    budget = (48 if single_core else 20) * 1024 * 1024     # per-step VMEM budget
    plane_bytes = 4 * h * w
    # 2 double-buffered input blocks + 2 output blocks + ~6 live f32 temporaries.
    bnc = max(1, budget // (10 * plane_bytes))
    bnc = min(bnc, nc)
    if not single_core and nc > 1:
        # v7x has two TensorCores: keep >= 2 "parallel" grid steps.
        bnc = min(bnc, -(-nc // 2))
    # Prefer a divisor of nc nearby (avoids a masked partial tail block).
    for cand in range(bnc, max(0, bnc - 32), -1):
        if cand >= 1 and nc % cand == 0:
            return cand
    return max(1, bnc)


def _vmem_limit_bytes():
    return (100 if _is_single_core_gen(_device_kind()) else 44) * 1024 * 1024


# --------------------------------------------------------------------------
# Wrapper
# --------------------------------------------------------------------------
def gaussian_layer(x, taps):
    """x: (N, C, H, W).  taps: length-K 1-D Gaussian taps (shared by all
    channels, exactly as GaussianLayerPicklable.weights_init sets them).

    Returns (N, C, H, W) == ReflectionPad2d(K//2) + depthwise Conv2d with the
    per-channel kernel outer(taps, taps), no bias.
    """
    N, C, H, W = x.shape
    taps = tuple(float(t) for t in np.asarray(taps).reshape(-1))
    K = len(taps)
    p = K // 2
    assert K % 2 == 1, "Gaussian kernel size must be odd"
    assert H > p and W > p, "ReflectionPad2d requires pad < spatial size"
    NC = N * C

    xr = x.reshape(NC, H, W)            # contiguous reshape: no HBM traffic
    bnc = _pick_block_planes(NC, H, W)
    grid = (pl.cdiv(NC, bnc),)
    # TODO(synk): add H-tiling with a K//2-row halo for extremely large H*W
    # where even a single-plane (1, H, W) block exceeds the VMEM budget.

    kernel = functools.partial(_gaussian_kernel, taps=taps, H=H, W=W)
    out = pl.pallas_call(
        kernel,
        out_shape=jax.ShapeDtypeStruct((NC, H, W), x.dtype),
        grid=grid,
        in_specs=[pl.BlockSpec((bnc, H, W), lambda i: (i, 0, 0))],
        out_specs=pl.BlockSpec((bnc, H, W), lambda i: (i, 0, 0)),
        compiler_params=pltpu.CompilerParams(
            dimension_semantics=("parallel",),
            vmem_limit_bytes=_vmem_limit_bytes()),
    )(xr)

    return out.reshape(N, C, H, W)


# --------------------------------------------------------------------------
# weights_init parity (host-side, numpy only — reproduces scipy's fold)
# --------------------------------------------------------------------------
def make_gaussian_taps(kernel):
    """Effective 1-D taps of GaussianLayerPicklable.weights_init.

    weights_init builds the KxK filter with scipy.ndimage.gaussian_filter
    (truncate=4.0, 'reflect' boundary) on a centered KxK delta, which equals
    outer(t, t) where t is the radius-int(4*sigma+0.5) normalized Gaussian
    correlated against a length-K centered delta with scipy's 'reflect'
    (symmetric) boundary.  This reproduces that fold without scipy.
    """
    sigma = 0.3 * ((kernel - 1) * 0.5 - 1) + 0.8
    radius = int(4.0 * sigma + 0.5)
    xs = np.arange(-radius, radius + 1, dtype=np.float64)
    phi = np.exp(-0.5 * xs ** 2 / sigma ** 2)
    phi /= phi.sum()

    def sym_reflect(j, n):  # scipy 'reflect': (d c b a | a b c d | d c b a)
        period = 2 * n
        j = j % period
        return j if j < n else period - 1 - j

    c = kernel // 2
    taps = np.zeros(kernel, dtype=np.float64)
    for i in range(kernel):
        for jj in range(-radius, radius + 1):
            if sym_reflect(i + jj, kernel) == c:
                taps[i] += phi[jj + radius]
    return taps.astype(np.float32)


# --------------------------------------------------------------------------
# Plain-JAX reference (ReflectionPad2d + depthwise conv)
# --------------------------------------------------------------------------
def _reference(x, w2d):
    N, C, H, W = x.shape
    K = w2d.shape[-1]
    p = K // 2
    xpad = jnp.pad(x, ((0, 0), (0, 0), (p, p), (p, p)), mode="reflect")
    return jax.lax.conv_general_dilated(
        xpad, w2d[:, None, :, :],
        window_strides=(1, 1), padding="VALID",
        dimension_numbers=("NCHW", "OIHW", "NCHW"),
        feature_group_count=C)


if __name__ == "__main__":
    key = jax.random.PRNGKey(0)
    N, C, H, W = 2, 4, 16, 16          # num_keypoints = 4
    K = 5                              # kernel size
    x = jax.random.normal(key, (N, C, H, W), dtype=jnp.float32)

    taps = make_gaussian_taps(K)                           # (K,) shared taps
    out = gaussian_layer(x, taps)
    out = jax.block_until_ready(out)

    g = jnp.asarray(taps)
    w2d = jnp.broadcast_to(jnp.outer(g, g), (C, K, K))     # per-channel 2-D kernel
    ref = _reference(x, w2d)

    assert out.shape == (N, C, H, W)
    assert jnp.allclose(out, ref, atol=1e-5, rtol=1e-5)
    print("KERNEL_OK")
</pallas_src>

<mosaic_0001>
module attributes {stable_mosaic.version = 11 : i64} {
  func.func @_gaussian_kernel(%arg0: i32, %arg1: memref<4x16x16xf32, #tpu.memory_space<vmem>>, %arg2: memref<4x16x16xf32, #tpu.memory_space<vmem>>) attributes {dimension_semantics = [#tpu.dimension_semantics<parallel>], iteration_bounds = array<i64: 2>, scalar_prefetch = 0 : i64, scratch_operands = 0 : i64, tpu.core_type = #tpu.core_type<tc>, window_params = [{transform_indices = @transform_0, window_bounds = array<i64: 4, 16, 16>}, {transform_indices = @transform_1, window_bounds = array<i64: 4, 16, 16>}]} {
    %c0 = arith.constant 0 : index
    %c0_0 = arith.constant 0 : index
    %c0_1 = arith.constant 0 : index
    %0 = vector.load %arg1[%c0, %c0_0, %c0_1] : memref<4x16x16xf32, #tpu.memory_space<vmem>>, vector<4x16x16xf32>
    %cst = arith.constant 0.362683475 : f32
    %1 = vector.broadcast %cst : f32 to vector<4x16x16xf32>
    %2 = arith.mulf %1, %0 : vector<4x16x16xf32>
    %c1_i32 = arith.constant 1 : i32
    %3 = tpu.dynamic_rotate %0 by %c1_i32 dim 1 : vector<4x16x16xf32>, i32 -> vector<4x16x16xf32>
    %cst_2 = arith.constant 0.240408137 : f32
    %4 = vector.broadcast %cst_2 : f32 to vector<4x16x16xf32>
    %5 = arith.mulf %4, %3 : vector<4x16x16xf32>
    %6 = arith.addf %2, %5 : vector<4x16x16xf32>
    %c15_i32 = arith.constant 15 : i32
    %7 = tpu.dynamic_rotate %0 by %c15_i32 dim 1 : vector<4x16x16xf32>, i32 -> vector<4x16x16xf32>
    %cst_3 = arith.constant 0.240408137 : f32
    %8 = vector.broadcast %cst_3 : f32 to vector<4x16x16xf32>
    %9 = arith.mulf %8, %7 : vector<4x16x16xf32>
    %10 = arith.addf %6, %9 : vector<4x16x16xf32>
    %c2_i32 = arith.constant 2 : i32
    %11 = tpu.dynamic_rotate %0 by %c2_i32 dim 1 : vector<4x16x16xf32>, i32 -> vector<4x16x16xf32>
    %cst_4 = arith.constant 0.0782501251 : f32
    %12 = vector.broadcast %cst_4 : f32 to vector<4x16x16xf32>
    %13 = arith.mulf %12, %11 : vector<4x16x16xf32>
    %14 = arith.addf %10, %13 : vector<4x16x16xf32>
    %c14_i32 = arith.constant 14 : i32
    %15 = tpu.dynamic_rotate %0 by %c14_i32 dim 1 : vector<4x16x16xf32>, i32 -> vector<4x16x16xf32>
    %cst_5 = arith.constant 0.0782501251 : f32
    %16 = vector.broadcast %cst_5 : f32 to vector<4x16x16xf32>
    %17 = arith.mulf %16, %15 : vector<4x16x16xf32>
    %18 = arith.addf %14, %17 : vector<4x16x16xf32>
    %19 = tpu.iota {dimensions = array<i32: 1>} : vector<4x16x16xi32>
    %20 = vector.extract_strided_slice %0 {offsets = [0, 2, 0], sizes = [4, 1, 16], strides = [1, 1, 1]} : vector<4x16x16xf32> to vector<4x1x16xf32>
    %cst_6 = arith.constant 0.0782501251 : f32
    %21 = vector.broadcast %cst_6 : f32 to vector<4x1x16xf32>
    %22 = arith.mulf %21, %20 : vector<4x1x16xf32>
    %23 = vector.extract_strided_slice %0 {offsets = [0, 1, 0], sizes = [4, 1, 16], strides = [1, 1, 1]} : vector<4x16x16xf32> to vector<4x1x16xf32>
    %cst_7 = arith.constant 0.240408137 : f32
    %24 = vector.broadcast %cst_7 : f32 to vector<4x1x16xf32>
    %25 = arith.mulf %24, %23 : vector<4x1x16xf32>
    %26 = arith.addf %22, %25 : vector<4x1x16xf32>
    %27 = vector.extract_strided_slice %0 {offsets = [0, 0, 0], sizes = [4, 1, 16], strides = [1, 1, 1]} : vector<4x16x16xf32> to vector<4x1x16xf32>
    %cst_8 = arith.constant 0.362683475 : f32
    %28 = vector.broadcast %cst_8 : f32 to vector<4x1x16xf32>
    %29 = arith.mulf %28, %27 : vector<4x1x16xf32>
    %30 = arith.addf %26, %29 : vector<4x1x16xf32>
    %31 = vector.extract_strided_slice %0 {offsets = [0, 1, 0], sizes = [4, 1, 16], strides = [1, 1, 1]} : vector<4x16x16xf32> to vector<4x1x16xf32>
    %cst_9 = arith.constant 0.240408137 : f32
    %32 = vector.broadcast %cst_9 : f32 to vector<4x1x16xf32>
    %33 = arith.mulf %32, %31 : vector<4x1x16xf32>
    %34 = arith.addf %30, %33 : vector<4x1x16xf32>
    %35 = vector.extract_strided_slice %0 {offsets = [0, 2, 0], sizes = [4, 1, 16], strides = [1, 1, 1]} : vector<4x16x16xf32> to vector<4x1x16xf32>
    %cst_10 = arith.constant 0.0782501251 : f32
    %36 = vector.broadcast %cst_10 : f32 to vector<4x1x16xf32>
    %37 = arith.mulf %36, %35 : vector<4x1x16xf32>
    %38 = arith.addf %34, %37 : vector<4x1x16xf32>
    %c0_i32 = arith.constant 0 : i32
    %39 = vector.broadcast %c0_i32 : i32 to vector<4x16x16xi32>
    %40 = arith.cmpi eq, %19, %39 : vector<4x16x16xi32>
    %41 = vector.shape_cast %38 : vector<4x1x16xf32> to vector<4x1x16xf32>
    %42 = vector.broadcast %41 : vector<4x1x16xf32> to vector<4x16x16xf32>
    %43 = arith.select %40, %42, %18 : vector<4x16x16xi1>, vector<4x16x16xf32>
    %44 = vector.extract_strided_slice %0 {offsets = [0, 1, 0], sizes = [4, 1, 16], strides = [1, 1, 1]} : vector<4x16x16xf32> to vector<4x1x16xf32>
    %cst_11 = arith.constant 0.0782501251 : f32
    %45 = vector.broadcast %cst_11 : f32 to vector<4x1x16xf32>
    %46 = arith.mulf %45, %44 : vector<4x1x16xf32>
    %47 = vector.extract_strided_slice %0 {offsets = [0, 0, 0], sizes = [4, 1, 16], strides = [1, 1, 1]} : vector<4x16x16xf32> to vector<4x1x16xf32>
    %cst_12 = arith.constant 0.240408137 : f32
    %48 = vector.broadcast %cst_12 : f32 to vector<4x1x16xf32>
    %49 = arith.mulf %48, %47 : vector<4x1x16xf32>
    %50 = arith.addf %46, %49 : vector<4x1x16xf32>
    %51 = vector.extract_strided_slice %0 {offsets = [0, 1, 0], sizes = [4, 1, 16], strides = [1, 1, 1]} : vector<4x16x16xf32> to vector<4x1x16xf32>
    %cst_13 = arith.constant 0.362683475 : f32
    %52 = vector.broadcast %cst_13 : f32 to vector<4x1x16xf32>
    %53 = arith.mulf %52, %51 : vector<4x1x16xf32>
    %54 = arith.addf %50, %53 : vector<4x1x16xf32>
    %55 = vector.extract_strided_slice %0 {offsets = [0, 2, 0], sizes = [4, 1, 16], strides = [1, 1, 1]} : vector<4x16x16xf32> to vector<4x1x16xf32>
    %cst_14 = arith.constant 0.240408137 : f32
    %56 = vector.broadcast %cst_14 : f32 to vector<4x1x16xf32>
    %57 = arith.mulf %56, %55 : vector<4x1x16xf32>
    %58 = arith.addf %54, %57 : vector<4x1x16xf32>
    %59 = vector.extract_strided_slice %0 {offsets = [0, 3, 0], sizes = [4, 1, 16], strides = [1, 1, 1]} : vector<4x16x16xf32> to vector<4x1x16xf32>
    %cst_15 = arith.constant 0.0782501251 : f32
    %60 = vector.broadcast %cst_15 : f32 to vector<4x1x16xf32>
    %61 = arith.mulf %60, %59 : vector<4x1x16xf32>
    %62 = arith.addf %58, %61 : vector<4x1x16xf32>
    %c1_i32_16 = arith.constant 1 : i32
    %63 = vector.broadcast %c1_i32_16 : i32 to vector<4x16x16xi32>
    %64 = arith.cmpi eq, %19, %63 : vector<4x16x16xi32>
    %65 = vector.shape_cast %62 : vector<4x1x16xf32> to vector<4x1x16xf32>
    %66 = vector.broadcast %65 : vector<4x1x16xf32> to vector<4x16x16xf32>
    %67 = arith.select %64, %66, %43 : vector<4x16x16xi1>, vector<4x16x16xf32>
    %68 = vector.extract_strided_slice %0 {offsets = [0, 12, 0], sizes = [4, 1, 16], strides = [1, 1, 1]} : vector<4x16x16xf32> to vector<4x1x16xf32>
    %cst_17 = arith.constant 0.0782501251 : f32
    %69 = vector.broadcast %cst_17 : f32 to vector<4x1x16xf32>
    %70 = arith.mulf %69, %68 : vector<4x1x16xf32>
    %71 = vector.extract_strided_slice %0 {offsets = [0, 13, 0], sizes = [4, 1, 16], strides = [1, 1, 1]} : vector<4x16x16xf32> to vector<4x1x16xf32>
    %cst_18 = arith.constant 0.240408137 : f32
    %72 = vector.broadcast %cst_18 : f32 to vector<4x1x16xf32>
    %73 = arith.mulf %72, %71 : vector<4x1x16xf32>
    %74 = arith.addf %70, %73 : vector<4x1x16xf32>
    %75 = vector.extract_strided_slice %0 {offsets = [0, 14, 0], sizes = [4, 1, 16], strides = [1, 1, 1]} : vector<4x16x16xf32> to vector<4x1x16xf32>
    %cst_19 = arith.constant 0.362683475 : f32
    %76 = vector.broadcast %cst_19 : f32 to vector<4x1x16xf32>
    %77 = arith.mulf %76, %75 : vector<4x1x16xf32>
    %78 = arith.addf %74, %77 : vector<4x1x16xf32>
    %79 = vector.extract_strided_slice %0 {offsets = [0, 15, 0], sizes = [4, 1, 16], strides = [1, 1, 1]} : vector<4x16x16xf32> to vector<4x1x16xf32>
    %cst_20 = arith.constant 0.240408137 : f32
    %80 = vector.broadcast %cst_20 : f32 to vector<4x1x16xf32>
    %81 = arith.mulf %80, %79 : vector<4x1x16xf32>
    %82 = arith.addf %78, %81 : vector<4x1x16xf32>
    %83 = vector.extract_strided_slice %0 {offsets = [0, 14, 0], sizes = [4, 1, 16], strides = [1, 1, 1]} : vector<4x16x16xf32> to vector<4x1x16xf32>
    %cst_21 = arith.constant 0.0782501251 : f32
    %84 = vector.broadcast %cst_21 : f32 to vector<4x1x16xf32>
    %85 = arith.mulf %84, %83 : vector<4x1x16xf32>
    %86 = arith.addf %82, %85 : vector<4x1x16xf32>
    %c14_i32_22 = arith.constant 14 : i32
    %87 = vector.broadcast %c14_i32_22 : i32 to vector<4x16x16xi32>
    %88 = arith.cmpi eq, %19, %87 : vector<4x16x16xi32>
    %89 = vector.shape_cast %86 : vector<4x1x16xf32> to vector<4x1x16xf32>
    %90 = vector.broadcast %89 : vector<4x1x16xf32> to vector<4x16x16xf32>
    %91 = arith.select %88, %90, %67 : vector<4x16x16xi1>, vector<4x16x16xf32>
    %92 = vector.extract_strided_slice %0 {offsets = [0, 13, 0], sizes = [4, 1, 16], strides = [1, 1, 1]} : vector<4x16x16xf32> to vector<4x1x16xf32>
    %cst_23 = arith.constant 0.0782501251 : f32
    %93 = vector.broadcast %cst_23 : f32 to vector<4x1x16xf32>
    %94 = arith.mulf %93, %92 : vector<4x1x16xf32>
    %95 = vector.extract_strided_slice %0 {offsets = [0, 14, 0], sizes = [4, 1, 16], strides = [1, 1, 1]} : vector<4x16x16xf32> to vector<4x1x16xf32>
    %cst_24 = arith.constant 0.240408137 : f32
    %96 = vector.broadcast %cst_24 : f32 to vector<4x1x16xf32>
    %97 = arith.mulf %96, %95 : vector<4x1x16xf32>
    %98 = arith.addf %94, %97 : vector<4x1x16xf32>
    %99 = vector.extract_strided_slice %0 {offsets = [0, 15, 0], sizes = [4, 1, 16], strides = [1, 1, 1]} : vector<4x16x16xf32> to vector<4x1x16xf32>
    %cst_25 = arith.constant 0.362683475 : f32
    %100 = vector.broadcast %cst_25 : f32 to vector<4x1x16xf32>
    %101 = arith.mulf %100, %99 : vector<4x1x16xf32>
    %102 = arith.addf %98, %101 : vector<4x1x16xf32>
    %103 = vector.extract_strided_slice %0 {offsets = [0, 14, 0], sizes = [4, 1, 16], strides = [1, 1, 1]} : vector<4x16x16xf32> to vector<4x1x16xf32>
    %cst_26 = arith.constant 0.240408137 : f32
    %104 = vector.broadcast %cst_26 : f32 to vector<4x1x16xf32>
    %105 = arith.mulf %104, %103 : vector<4x1x16xf32>
    %106 = arith.addf %102, %105 : vector<4x1x16xf32>
    %107 = vector.extract_strided_slice %0 {offsets = [0, 13, 0], sizes = [4, 1, 16], strides = [1, 1, 1]} : vector<4x16x16xf32> to vector<4x1x16xf32>
    %cst_27 = arith.constant 0.0782501251 : f32
    %108 = vector.broadcast %cst_27 : f32 to vector<4x1x16xf32>
    %109 = arith.mulf %108, %107 : vector<4x1x16xf32>
    %110 = arith.addf %106, %109 : vector<4x1x16xf32>
    %c15_i32_28 = arith.constant 15 : i32
    %111 = vector.broadcast %c15_i32_28 : i32 to vector<4x16x16xi32>
    %112 = arith.cmpi eq, %19, %111 : vector<4x16x16xi32>
    %113 = vector.shape_cast %110 : vector<4x1x16xf32> to vector<4x1x16xf32>
    %114 = vector.broadcast %113 : vector<4x1x16xf32> to vector<4x16x16xf32>
    %115 = arith.select %112, %114, %91 : vector<4x16x16xi1>, vector<4x16x16xf32>
    %cst_29 = arith.constant 0.362683475 : f32
    %116 = vector.broadcast %cst_29 : f32 to vector<4x16x16xf32>
    %117 = arith.mulf %116, %115 : vector<4x16x16xf32>
    %c1_i32_30 = arith.constant 1 : i32
    %118 = tpu.dynamic_rotate %115 by %c1_i32_30 dim 2 : vector<4x16x16xf32>, i32 -> vector<4x16x16xf32>
    %cst_31 = arith.constant 0.240408137 : f32
    %119 = vector.broadcast %cst_31 : f32 to vector<4x16x16xf32>
    %120 = arith.mulf %119, %118 : vector<4x16x16xf32>
    %121 = arith.addf %117, %120 : vector<4x16x16xf32>
    %c15_i32_32 = arith.constant 15 : i32
    %122 = tpu.dynamic_rotate %115 by %c15_i32_32 dim 2 : vector<4x16x16xf32>, i32 -> vector<4x16x16xf32>
    %cst_33 = arith.constant 0.240408137 : f32
    %123 = vector.broadcast %cst_33 : f32 to vector<4x16x16xf32>
    %124 = arith.mulf %123, %122 : vector<4x16x16xf32>
    %125 = arith.addf %121, %124 : vector<4x16x16xf32>
    %c2_i32_34 = arith.constant 2 : i32
    %126 = tpu.dynamic_rotate %115 by %c2_i32_34 dim 2 : vector<4x16x16xf32>, i32 -> vector<4x16x16xf32>
    %cst_35 = arith.constant 0.0782501251 : f32
    %127 = vector.broadcast %cst_35 : f32 to vector<4x16x16xf32>
    %128 = arith.mulf %127, %126 : vector<4x16x16xf32>
    %129 = arith.addf %125, %128 : vector<4x16x16xf32>
    %c14_i32_36 = arith.constant 14 : i32
    %130 = tpu.dynamic_rotate %115 by %c14_i32_36 dim 2 : vector<4x16x16xf32>, i32 -> vector<4x16x16xf32>
    %cst_37 = arith.constant 0.0782501251 : f32
    %131 = vector.broadcast %cst_37 : f32 to vector<4x16x16xf32>
    %132 = arith.mulf %131, %130 : vector<4x16x16xf32>
    %133 = arith.addf %129, %132 : vector<4x16x16xf32>
    %134 = tpu.iota {dimensions = array<i32: 2>} : vector<4x16x16xi32>
    %135 = vector.extract_strided_slice %115 {offsets = [0, 0, 2], sizes = [4, 16, 1], strides = [1, 1, 1]} : vector<4x16x16xf32> to vector<4x16x1xf32>
    %cst_38 = arith.constant 0.0782501251 : f32
    %136 = vector.broadcast %cst_38 : f32 to vector<4x16x1xf32>
    %137 = arith.mulf %136, %135 : vector<4x16x1xf32>
    %138 = vector.extract_strided_slice %115 {offsets = [0, 0, 1], sizes = [4, 16, 1], strides = [1, 1, 1]} : vector<4x16x16xf32> to vector<4x16x1xf32>
    %cst_39 = arith.constant 0.240408137 : f32
    %139 = vector.broadcast %cst_39 : f32 to vector<4x16x1xf32>
    %140 = arith.mulf %139, %138 : vector<4x16x1xf32>
    %141 = arith.addf %137, %140 : vector<4x16x1xf32>
    %142 = vector.extract_strided_slice %115 {offsets = [0, 0, 0], sizes = [4, 16, 1], strides = [1, 1, 1]} : vector<4x16x16xf32> to vector<4x16x1xf32>
    %cst_40 = arith.constant 0.362683475 : f32
    %143 = vector.broadcast %cst_40 : f32 to vector<4x16x1xf32>
    %144 = arith.mulf %143, %142 : vector<4x16x1xf32>
    %145 = arith.addf %141, %144 : vector<4x16x1xf32>
    %146 = vector.extract_strided_slice %115 {offsets = [0, 0, 1], sizes = [4, 16, 1], strides = [1, 1, 1]} : vector<4x16x16xf32> to vector<4x16x1xf32>
    %cst_41 = arith.constant 0.240408137 : f32
    %147 = vector.broadcast %cst_41 : f32 to vector<4x16x1xf32>
    %148 = arith.mulf %147, %146 : vector<4x16x1xf32>
    %149 = arith.addf %145, %148 : vector<4x16x1xf32>
    %150 = vector.extract_strided_slice %115 {offsets = [0, 0, 2], sizes = [4, 16, 1], strides = [1, 1, 1]} : vector<4x16x16xf32> to vector<4x16x1xf32>
    %cst_42 = arith.constant 0.0782501251 : f32
    %151 = vector.broadcast %cst_42 : f32 to vector<4x16x1xf32>
    %152 = arith.mulf %151, %150 : vector<4x16x1xf32>
    %153 = arith.addf %149, %152 : vector<4x16x1xf32>
    %c0_i32_43 = arith.constant 0 : i32
    %154 = vector.broadcast %c0_i32_43 : i32 to vector<4x16x16xi32>
    %155 = arith.cmpi eq, %134, %154 : vector<4x16x16xi32>
    %156 = vector.shape_cast %153 : vector<4x16x1xf32> to vector<4x16x1xf32>
    %157 = vector.broadcast %156 : vector<4x16x1xf32> to vector<4x16x16xf32>
    %158 = arith.select %155, %157, %133 : vector<4x16x16xi1>, vector<4x16x16xf32>
    %159 = vector.extract_strided_slice %115 {offsets = [0, 0, 1], sizes = [4, 16, 1], strides = [1, 1, 1]} : vector<4x16x16xf32> to vector<4x16x1xf32>
    %cst_44 = arith.constant 0.0782501251 : f32
    %160 = vector.broadcast %cst_44 : f32 to vector<4x16x1xf32>
    %161 = arith.mulf %160, %159 : vector<4x16x1xf32>
    %162 = vector.extract_strided_slice %115 {offsets = [0, 0, 0], sizes = [4, 16, 1], strides = [1, 1, 1]} : vector<4x16x16xf32> to vector<4x16x1xf32>
    %cst_45 = arith.constant 0.240408137 : f32
    %163 = vector.broadcast %cst_45 : f32 to vector<4x16x1xf32>
    %164 = arith.mulf %163, %162 : vector<4x16x1xf32>
    %165 = arith.addf %161, %164 : vector<4x16x1xf32>
    %166 = vector.extract_strided_slice %115 {offsets = [0, 0, 1], sizes = [4, 16, 1], strides = [1, 1, 1]} : vector<4x16x16xf32> to vector<4x16x1xf32>
    %cst_46 = arith.constant 0.362683475 : f32
    %167 = vector.broadcast %cst_46 : f32 to vector<4x16x1xf32>
    %168 = arith.mulf %167, %166 : vector<4x16x1xf32>
    %169 = arith.addf %165, %168 : vector<4x16x1xf32>
    %170 = vector.extract_strided_slice %115 {offsets = [0, 0, 2], sizes = [4, 16, 1], strides = [1, 1, 1]} : vector<4x16x16xf32> to vector<4x16x1xf32>
    %cst_47 = arith.constant 0.240408137 : f32
    %171 = vector.broadcast %cst_47 : f32 to vector<4x16x1xf32>
    %172 = arith.mulf %171, %170 : vector<4x16x1xf32>
    %173 = arith.addf %169, %172 : vector<4x16x1xf32>
    %174 = vector.extract_strided_slice %115 {offsets = [0, 0, 3], sizes = [4, 16, 1], strides = [1, 1, 1]} : vector<4x16x16xf32> to vector<4x16x1xf32>
    %cst_48 = arith.constant 0.0782501251 : f32
    %175 = vector.broadcast %cst_48 : f32 to vector<4x16x1xf32>
    %176 = arith.mulf %175, %174 : vector<4x16x1xf32>
    %177 = arith.addf %173, %176 : vector<4x16x1xf32>
    %c1_i32_49 = arith.constant 1 : i32
    %178 = vector.broadcast %c1_i32_49 : i32 to vector<4x16x16xi32>
    %179 = arith.cmpi eq, %134, %178 : vector<4x16x16xi32>
    %180 = vector.shape_cast %177 : vector<4x16x1xf32> to vector<4x16x1xf32>
    %181 = vector.broadcast %180 : vector<4x16x1xf32> to vector<4x16x16xf32>
    %182 = arith.select %179, %181, %158 : vector<4x16x16xi1>, vector<4x16x16xf32>
    %183 = vector.extract_strided_slice %115 {offsets = [0, 0, 12], sizes = [4, 16, 1], strides = [1, 1, 1]} : vector<4x16x16xf32> to vector<4x16x1xf32>
    %cst_50 = arith.constant 0.0782501251 : f32
    %184 = vector.broadcast %cst_50 : f32 to vector<4x16x1xf32>
    %185 = arith.mulf %184, %183 : vector<4x16x1xf32>
    %186 = vector.extract_strided_slice %115 {offsets = [0, 0, 13], sizes = [4, 16, 1], strides = [1, 1, 1]} : vector<4x16x16xf32> to vector<4x16x1xf32>
    %cst_51 = arith.constant 0.240408137 : f32
    %187 = vector.broadcast %cst_51 : f32 to vector<4x16x1xf32>
    %188 = arith.mulf %187, %186 : vector<4x16x1xf32>
    %189 = arith.addf %185, %188 : vector<4x16x1xf32>
    %190 = vector.extract_strided_slice %115 {offsets = [0, 0, 14], sizes = [4, 16, 1], strides = [1, 1, 1]} : vector<4x16x16xf32> to vector<4x16x1xf32>
    %cst_52 = arith.constant 0.362683475 : f32
    %191 = vector.broadcast %cst_52 : f32 to vector<4x16x1xf32>
    %192 = arith.mulf %191, %190 : vector<4x16x1xf32>
    %193 = arith.addf %189, %192 : vector<4x16x1xf32>
    %194 = vector.extract_strided_slice %115 {offsets = [0, 0, 15], sizes = [4, 16, 1], strides = [1, 1, 1]} : vector<4x16x16xf32> to vector<4x16x1xf32>
    %cst_53 = arith.constant 0.240408137 : f32
    %195 = vector.broadcast %cst_53 : f32 to vector<4x16x1xf32>
    %196 = arith.mulf %195, %194 : vector<4x16x1xf32>
    %197 = arith.addf %193, %196 : vector<4x16x1xf32>
    %198 = vector.extract_strided_slice %115 {offsets = [0, 0, 14], sizes = [4, 16, 1], strides = [1, 1, 1]} : vector<4x16x16xf32> to vector<4x16x1xf32>
    %cst_54 = arith.constant 0.0782501251 : f32
    %199 = vector.broadcast %cst_54 : f32 to vector<4x16x1xf32>
    %200 = arith.mulf %199, %198 : vector<4x16x1xf32>
    %201 = arith.addf %197, %200 : vector<4x16x1xf32>
    %c14_i32_55 = arith.constant 14 : i32
    %202 = vector.broadcast %c14_i32_55 : i32 to vector<4x16x16xi32>
    %203 = arith.cmpi eq, %134, %202 : vector<4x16x16xi32>
    %204 = vector.shape_cast %201 : vector<4x16x1xf32> to vector<4x16x1xf32>
    %205 = vector.broadcast %204 : vector<4x16x1xf32> to vector<4x16x16xf32>
    %206 = arith.select %203, %205, %182 : vector<4x16x16xi1>, vector<4x16x16xf32>
    %207 = vector.extract_strided_slice %115 {offsets = [0, 0, 13], sizes = [4, 16, 1], strides = [1, 1, 1]} : vector<4x16x16xf32> to vector<4x16x1xf32>
    %cst_56 = arith.constant 0.0782501251 : f32
    %208 = vector.broadcast %cst_56 : f32 to vector<4x16x1xf32>
    %209 = arith.mulf %208, %207 : vector<4x16x1xf32>
    %210 = vector.extract_strided_slice %115 {offsets = [0, 0, 14], sizes = [4, 16, 1], strides = [1, 1, 1]} : vector<4x16x16xf32> to vector<4x16x1xf32>
    %cst_57 = arith.constant 0.240408137 : f32
    %211 = vector.broadcast %cst_57 : f32 to vector<4x16x1xf32>
    %212 = arith.mulf %211, %210 : vector<4x16x1xf32>
    %213 = arith.addf %209, %212 : vector<4x16x1xf32>
    %214 = vector.extract_strided_slice %115 {offsets = [0, 0, 15], sizes = [4, 16, 1], strides = [1, 1, 1]} : vector<4x16x16xf32> to vector<4x16x1xf32>
    %cst_58 = arith.constant 0.362683475 : f32
    %215 = vector.broadcast %cst_58 : f32 to vector<4x16x1xf32>
    %216 = arith.mulf %215, %214 : vector<4x16x1xf32>
    %217 = arith.addf %213, %216 : vector<4x16x1xf32>
    %218 = vector.extract_strided_slice %115 {offsets = [0, 0, 14], sizes = [4, 16, 1], strides = [1, 1, 1]} : vector<4x16x16xf32> to vector<4x16x1xf32>
    %cst_59 = arith.constant 0.240408137 : f32
    %219 = vector.broadcast %cst_59 : f32 to vector<4x16x1xf32>
    %220 = arith.mulf %219, %218 : vector<4x16x1xf32>
    %221 = arith.addf %217, %220 : vector<4x16x1xf32>
    %222 = vector.extract_strided_slice %115 {offsets = [0, 0, 13], sizes = [4, 16, 1], strides = [1, 1, 1]} : vector<4x16x16xf32> to vector<4x16x1xf32>
    %cst_60 = arith.constant 0.0782501251 : f32
    %223 = vector.broadcast %cst_60 : f32 to vector<4x16x1xf32>
    %224 = arith.mulf %223, %222 : vector<4x16x1xf32>
    %225 = arith.addf %221, %224 : vector<4x16x1xf32>
    %c15_i32_61 = arith.constant 15 : i32
    %226 = vector.broadcast %c15_i32_61 : i32 to vector<4x16x16xi32>
    %227 = arith.cmpi eq, %134, %226 : vector<4x16x16xi32>
    %228 = vector.shape_cast %225 : vector<4x16x1xf32> to vector<4x16x1xf32>
    %229 = vector.broadcast %228 : vector<4x16x1xf32> to vector<4x16x16xf32>
    %230 = arith.select %227, %229, %206 : vector<4x16x16xi1>, vector<4x16x16xf32>
    %c0_62 = arith.constant 0 : index
    %c0_63 = arith.constant 0 : index
    %c0_64 = arith.constant 0 : index
    %231 = vector.load %arg2[%c0_62, %c0_63, %c0_64] : memref<4x16x16xf32, #tpu.memory_space<vmem>>, vector<4x16x16xf32>
    tpu.vector_store %arg2[%c0_62, %c0_63, %c0_64], %230 {strides = array<i32>} : memref<4x16x16xf32, #tpu.memory_space<vmem>>, vector<4x16x16xf32>,
    return
  }
  func.func @transform_0(%arg0: i32) -> (i32, i32, i32) {
    %c0_i32 = arith.constant 0 : i32
    %c0_i32_0 = arith.constant 0 : i32
    %c0_i32_1 = arith.constant 0 : i32
    return %arg0, %c0_i32, %c0_i32_0 : i32, i32, i32
  }
  func.func @transform_1(%arg0: i32) -> (i32, i32, i32) {
    %c0_i32 = arith.constant 0 : i32
    %c0_i32_0 = arith.constant 0 : i32
    %c0_i32_1 = arith.constant 0 : i32
    return %arg0, %c0_i32, %c0_i32_0 : i32, i32, i32
  }
}

</mosaic_0001>

<bundles_post_ra>
// kernel: tpu_custom_call.1
= control target key start
LH: loop header
LB: loop body
LE: loop exit
PB: predicated region body
PF: predicated region fallthrough
CT: control target
= control target key end

     0   :  { %6 = vsyncpa [#allocation3], 0  ;;  %s2525_s0 = inlined_call_operand.hbm [shape: f32[8,16,16], index: 0, kind: input, shape index: {}]   ;;  %s2526_s1 = inlined_call_operand.hbm [shape: f32[8,16,16], index: 1, kind: output, shape index: {}]  }
   0x1   :  { %8 = vsyncpa [#allocation3 + $0x1], 0 }
   0x2   :  { %9 = vsyncpa [#allocation4], 0 }
   0x3   :  { %11 = vsyncpa [#allocation4 + $0x1], 0  ;;  %s1523_s6 = smov 0   ;;  %s1525_s7 = smov 0  }
   0x4   :  { %s1527_s8 = smov 0   ;;  %s1529_s9 = smov 0  }
   0x5 LB: > { %s1544_s10 = sadd.s32 4294967295, %s1495_s9   ;;  %s1305_s11 = sadd.s32 4294967294, %s1495_s9   ;;  %s1495_s9 = sphi %s1529_s9, %s2564_s9   ;;  %s1491_s8 = sphi %s1527_s8, %s2563_s8   ;;  %s1487_s7 = sphi %s1525_s7, %s2562_s7   ;;  %s1483_s6 = sphi %s1523_s6, %s2561_s6  }
   0x6   : > { %s1548_s12 = sadd.s32 1, %s1495_s9   ;;  %s24_s13 = sadd.s32 1, %s1491_s8 }
   0x7   : > { %s21_s14 = ssub.s32 %s1495_s9, %s1548_s12  ;;  %p31_p0 = scmp.ne.s32.totalorder %s1491_s8, %s1487_s7 }
   0x8   : > { %p22_p1 = scmp.eq.s32.totalorder %s21_s14, 0  ;;  %p32_p2 = scmp.eq.s32.totalorder %s1495_s9, 0 }
   0x9   : > { %p37_p3 = scmp.ne.s32.totalorder %s1487_s7, %s1483_s6  ;;  %p38_p4 = scmp.eq.s32.totalorder %s1544_s10, 0 }
   0xa   : > { %s1560_s15 = scalar_select %p22_p1, %s1491_s8, %s24_s13  }
   0xb   : > { %p1562_p5 = por %p32_p2, %p31_p0  ;;  %p1566_p6 = por %p38_p4, %p37_p3 }
   0xc   : > { %p61_p7 = scmp.eq.s32.totalorder %s1544_s10, 1  ;;  %p67_p8 = scmp.eq.s32.totalorder %s1305_s11, 1 }
   0xd   : > { %p1337_p10 = scmp.lt.s32.totalorder %s1495_s9, 2  ;;  %s87_s20 = sand.u32 1, %s1491_s8  }
   0xe   : > { %p1573_p11 = por %p61_p7, %p31_p0  ;;  %p1577_p12 = por %p67_p8, %p37_p3 }
   0xf   : > { %s1322_s21 = sshll.u32 %s1495_s9, 6  ;;  %s1308_s22 = sshll.u32 %s87_s20, 6 }
  0x10   : > { %s97_s25 = scalar_lea.hbm %s2525_s0, %s1322_s21  ;;  %s91_s27 = scalar_lea.vmem [#allocation2], %s1308_s22 }
  0x11   : > { %s98_s26 = sshll.u32 %s97_s25, 4  ;;  %s100_s28 = sshll.u32 %s91_s27, 4  ;;  %s99_s26 = int_to_ptr.hbm [resolvable:$true] %s98_s26  ;;  %s101_s28 = int_to_ptr.vmem [resolvable:$true] %s100_s28 }
  0x12   : > { %p1588_p13 = pnand %p1337_p10, %p1562_p5  ;;  %p1312_p0 = scmp.ge.s32.totalorder %s1495_s9, 1 }
  0x13   : > { %p108_p1 = scmp.lt.s32.totalorder %s1495_s9, 3  ;;  %s88_s30 = scalar_lea.sflag [#allocation3], %s87_s20 }
  0x14   : > { %s1399_s2 = sshra.s32 %s99_s26, 4  ;;  %p1403_p3 = pneg %p1588_p13  ;;  %s1400_s2 = int_to_ptr.hbm [resolvable:$true] %s1399_s2 }
  0x15   : > { %s1401_s3 = scalar_lea.hbm %s1400_s2, 64  ;;  %s1406_s11 = scalar_lea.hbm %s2525_s0, 128 }
  0x16   : > { %p1402_p2 = scmp.ne.s32.totalorder %s1400_s2, %s1401_s3  ;;  %p1407_p5 = scmp.lt.s32.totalorder %s1400_s2, %s2525_s0 }
  0x17   : > { %p1408_p8 = scmp.lt.s32.totalorder %s1406_s11, %s1401_s3 }
  0x18   : > { %p1404_p4 = pnand %p1403_p3, %p1402_p2 }
  0x19   : > { %p1409_p10 = por %p1408_p8, %p1407_p5 }
  0x1a   : > { %p1405_p7 = pneg %p1404_p4 }
  0x1c   : > { %p1410_p9 = pnand %p1409_p10, %p1405_p7 }
  0x1e   : > { %1413 = shalt.err (!%p1410_p9)
}
  0x1f   : > { %s1497_s16 = smov 128   ;;  %s1498_s20 = smov 8  }
  0x20   : > { %1332 = dma.hbm_to_vmem [thread:$0]  (!%p1588_p13), %s99_s26, 1024, %s101_s28, %s88_s30, %s1497_s16, %s1497_s16, %s1498_s20  }
  0x21   : > { %p109_p2 = pnand %p1312_p0, %p108_p1 }
  0x23   : > { %112 = sbr.rel (%p109_p2) target bundleno = 794 (0x31a), region = 24 }
  0x28   : > { %s1609_s21 = sand.u32 1, %s1487_s7  }
  0x29   : > { %s1313_s22 = sshll.u32 %s1609_s21, 6  ;;  %s115_s23 = scalar_lea.sflag [#allocation3], %s1609_s21 }
  0x2a   : > { %s1615_s24 = scalar_lea.vmem [#allocation2], %s1313_s22 }
  0x2b   : > { %1474 = dma.done.wait (%p1566_p6), %s115_s23, 1024  }
  0x2c   : > { %1476 = vsyncadd (%p1566_p6), %s115_s23, 4294966272  ;;  %v2527_v0 = vlaneseq  ;;  %v1625_v2 = vld [vmem:[%s1615_s24 + $0x20] sm:$0xff]  ;;  %v1628_v3 = vld [vmem:[%s1615_s24 + $0x28] sm:$0xff]  ;;  %s1499_s17 = smov 16   ;;  %s1500_s25 = smov 1   ;;  %vm511_vm8 = vcmask 1047680  }
  0x2d   : > { %v152_v4 = vmul.f32 0.36268348, %v1625_v2  ;;  %v158_v5 = vrot.slane %v1625_v2, 7  ;;  %v162_v6 = vrot.slane %v1628_v3, 7  ;;  %v193_v7 = vrot.slane %v1625_v2, 1  ;;  %v1664_v20 = vld [vmem:[%s1615_s24 + $0x10] sm:$0xff] }
  0x2e   : > { %v1622_v1 = vshrl.u32 %v2527_v0, 7  ;;  %v197_v8 = vrot.slane %v1628_v3, 1  ;;  %v226_v9 = vrot.slane %v1625_v2, 6  ;;  %v230_v10 = vrot.slane %v1628_v3, 6  ;;  %v1667_v21 = vld [vmem:[%s1615_s24 + $0x18] sm:$0xff]  ;;  %v1706_v58 = vld [vmem:[%s1615_s24] sm:$0xff] }
  0x2f   : > { %v259_v11 = vrot.slane %v1625_v2, 2  ;;  %v263_v13 = vrot.slane %v1628_v3, 2  ;;  %v293_v14 = vmul.f32 0.078250125, %v1625_v2  ;;  %v297_v15 = vmul.f32 0.24040814, %v1625_v2 }
  0x30   : > { %vm166_vm0 = vcmp.lt.s32.totalorder %v1622_v1, 1  ;;  %vm199_vm1 = vcmp.lt.s32.totalorder %v1622_v1, 7  ;;  %vm232_vm2 = vcmp.lt.s32.totalorder %v1622_v1, 2  ;;  %vm265_vm3 = vcmp.lt.s32.totalorder %v1622_v1, 6  ;;  %v1716_v62 = vld [vmem:[%s1615_s24 + $0x8] sm:$0xff]  ;;  %s1501_s26 = smov 2  }
  0x31   : > { %v173_v12 = vsel %vm166_vm0, %v162_v6, %v158_v5  ;;  %v202_v17 = vsel %vm199_vm1, %v193_v7, %v197_v8  ;;  %v239_v18 = vsel %vm232_vm2, %v230_v10, %v226_v9  ;;  %v321_v19 = vrot.slane %v152_v4, 6  ;;  %s1502_s27 = smov 127   ;;  %s1503_s28 = smov 126  }
  0x32   : > { %v179_v16 = vmul.f32 0.24040814, %v173_v12  ;;  %v212_v22 = vmul.f32 0.24040814, %v202_v17  ;;  %v245_v23 = vmul.f32 0.078250125, %v239_v18  ;;  %v268_v24 = vsel %vm265_vm3, %v259_v11, %v263_v13 }
  0x33   : > { %v305_v25 = vrot.slane %v297_v15, 7  ;;  %v278_v27 = vmul.f32 0.078250125, %v268_v24  ;;  %vm339_vm4 = vcmp.eq.s32.totalorder %v1622_v1, 0  ;;  %v359_v28 = vrot.slane %v297_v15, 1  ;;  %s1506_s29 = smov 113  }
  0x34   : > { %v187_v26 = vadd.f32 %v179_v16, %v152_v4  ;;  %v375_v29 = vrot.slane %v293_v14, 2  ;;  %v150_v31 = vmul.f32 0.36268348, %v1664_v20  ;;  %v157_v32 = vrot.slane %v1664_v20, 7  ;;  %s1507_s30 = smov 114   ;;  %s1508_s2 = smov 125  }
  0x35   : > { %v313_v30 = vadd.f32 %v305_v25, %v293_v14  ;;  %v161_v33 = vrot.slane %v1667_v21, 7  ;;  %v192_v35 = vrot.slane %v1664_v20, 1  ;;  %v196_v36 = vrot.slane %v1667_v21, 1  ;;  %s2399_s3 = scalar_lea.vmem [#allocation5], %s1313_s22  ;;  %s1324_s4 = sshll.u32 %s1544_s10, 6 }
  0x36   : > { %v220_v34 = vadd.f32 %v212_v22, %v187_v26  ;;  %v225_v37 = vrot.slane %v1664_v20, 6  ;;  %v229_v41 = vrot.slane %v1667_v21, 6  ;;  %v258_v45 = vrot.slane %v1664_v20, 2  ;;  %s1228_s10 = scalar_lea.hbm %s2526_s1, %s1324_s4  ;;  %s1229_s13 = sshll.u32 %s2399_s3, 4  ;;  %s2475_s13 = int_to_ptr.vmem [resolvable:$true] %s1229_s13 }
  0x37   : > { %v329_v38 = vadd.f32 %v321_v19, %v313_v30  ;;  %v355_v39 = vadd.f32 %v313_v30, %v152_v4  ;;  %v172_v40 = vsel %vm166_vm0, %v161_v33, %v157_v32  ;;  %v201_v44 = vsel %vm199_vm1, %v192_v35, %v196_v36  ;;  %s1231_s14 = sshll.u32 %s1228_s10, 4  ;;  %s1216_s16 = scalar_lea.sflag [#allocation4], %s1609_s21  ;;  %s1232_s14 = int_to_ptr.hbm [resolvable:$true] %s1231_s14 }
  0x38   : > { %v253_v42 = vadd.f32 %v245_v23, %v220_v34  ;;  %v177_v43 = vmul.f32 0.24040814, %v172_v40  ;;  %v210_v48 = vmul.f32 0.24040814, %v201_v44  ;;  %v238_v49 = vsel %vm232_vm2, %v229_v41, %v225_v37  ;;  %s1443_s20 = sshra.s32 %s1232_s14, 4  ;;  %s1444_s20 = int_to_ptr.hbm [resolvable:$true] %s1443_s20 }
  0x39   : > { %v333_v46 = vadd.f32 %v329_v38, %v305_v25  ;;  %v367_v47 = vadd.f32 %v359_v28, %v355_v39  ;;  %v243_v52 = vmul.f32 0.078250125, %v238_v49  ;;  %v262_v53 = vrot.slane %v1667_v21, 2  ;;  %s1445_s22 = scalar_lea.hbm %s1444_s20, 64  ;;  %p1450_p0 = scmp.lt.s32.totalorder %s1444_s20, %s2526_s1 }
  0x3a   : > { %v286_v50 = vadd.f32 %v278_v27, %v253_v42  ;;  %v185_v51 = vadd.f32 %v177_v43, %v150_v31  ;;  %v292_v56 = vmul.f32 0.078250125, %v1664_v20  ;;  %v296_v57 = vmul.f32 0.24040814, %v1664_v20  ;;  %p1446_p6 = scmp.ne.s32.totalorder %s1444_s20, %s1445_s22 }
  0x3b   : > { %v337_v54 = vadd.f32 %v333_v46, %v293_v14  ;;  %v383_v55 = vadd.f32 %v375_v29, %v367_v47  ;;  %vm385_vm5 = vcmp.eq.s32.totalorder %v1622_v1, 1  ;;  %v267_v60 = vsel %vm265_vm3, %v258_v45, %v262_v53 }
  0x3c   : > { %v218_v59 = vadd.f32 %v210_v48, %v185_v51  ;;  %v320_v61 = vrot.slane %v150_v31, 6  ;;  %v304_v12 = vrot.slane %v296_v57, 7  ;;  %v148_v14 = vmul.f32 0.36268348, %v1706_v58  ;;  %p1447_p9 = pnand %p1446_p6, %p1573_p11 }
  0x3d   : > { %v343_v63 = vperm.slane %v337_v54, 2  ;;  %v389_v4 = vperm.slane %v383_v55, 1  ;;  %v276_v16 = vmul.f32 0.078250125, %v267_v60  ;;  %v358_v17 = vrot.slane %v296_v57, 1 }
  0x3e   : > { %v251_v15 = vadd.f32 %v243_v52, %v218_v59  ;;  %v156_v18 = vrot.slane %v1706_v58, 7  ;;  %v312_v22 = vadd.f32 %v304_v12, %v292_v56  ;;  %v160_v23 = vrot.slane %v1716_v62, 7  ;;  %p1448_p13 = pneg %p1447_p9 }
  0x3f   : > { %v349_v19 = vsel %vm339_vm4, %v343_v63, %v286_v50  ;;  %v191_v24 = vrot.slane %v1706_v58, 1  ;;  %v374_v26 = vrot.slane %v292_v56, 2  ;;  %v195_v27 = vrot.slane %v1716_v62, 1 }
  0x40   : > { %v1726_v25 = vsel %vm385_vm5, %v389_v4, %v349_v19  ;;  %v224_v28 = vrot.slane %v1706_v58, 6  ;;  %v328_v29 = vadd.f32 %v320_v61, %v312_v22  ;;  %v354_v30 = vadd.f32 %v312_v22, %v150_v31 }
  0x41   : > { %524 = vrot.lane.b32.xlu2 %v1726_v25, %s1499_s17  ;;  %v171_v34 = vsel %vm166_vm0, %v160_v23, %v156_v18  ;;  %v228_v38 = vrot.slane %v1716_v62, 6  ;;  %v200_v40 = vsel %vm199_vm1, %v191_v24, %v195_v27  ;;  %v257_v42 = vrot.slane %v1706_v58, 2 }
  0x42   : > { %v175_v39 = vmul.f32 0.24040814, %v171_v34  ;;  %v261_v31 = vrot.slane %v1716_v62, 2  ;;  %v332_v43 = vadd.f32 %v328_v29, %v304_v12  ;;  %v366_v44 = vadd.f32 %v358_v17, %v354_v30 }
  0x43   : > { %v208_v46 = vmul.f32 0.24040814, %v200_v40  ;;  %v237_v47 = vsel %vm232_vm2, %v228_v38, %v224_v28  ;;  %v284_v48 = vadd.f32 %v276_v16, %v251_v15  ;;  %v291_v55 = vmul.f32 0.078250125, %v1706_v58 }
  0x44   : > { %v183_v49 = vadd.f32 %v175_v39, %v148_v14  ;;  %v241_v50 = vmul.f32 0.078250125, %v237_v47  ;;  %v266_v51 = vsel %vm265_vm3, %v257_v42, %v261_v31  ;;  %v336_v52 = vadd.f32 %v332_v43, %v292_v56 }
  0x45   : > { %v382_v54 = vadd.f32 %v374_v26, %v366_v44  ;;  %v295_v57 = vmul.f32 0.24040814, %v1706_v58  ;;  %v274_v60 = vmul.f32 0.078250125, %v266_v51  ;;  %v319_v61 = vrot.slane %v148_v14, 6 }
  0x46   : > { %v216_v59 = vadd.f32 %v208_v46, %v183_v49  ;;  %v153_v63 = vmul.f32 0.36268348, %v1628_v3  ;;  %v342_v4 = vperm.slane %v336_v52, 2  ;;  %v169_v56 = vsel %vm166_vm0, %v158_v5, %v162_v6 }
  0x47   : > { %v388_v12 = vperm.slane %v382_v54, 1  ;;  %v303_v15 = vrot.slane %v295_v57, 7  ;;  %v357_v16 = vrot.slane %v295_v57, 1  ;;  %v206_v19 = vsel %vm199_vm1, %v197_v8, %v193_v7 }
  0x48   : > { %v249_v17 = vadd.f32 %v241_v50, %v216_v59  ;;  %v235_v22 = vsel %vm232_vm2, %v226_v9, %v230_v10  ;;  %v347_v26 = vsel %vm339_vm4, %v342_v4, %v284_v48  ;;  %v180_v30 = vmul.f32 0.24040814, %v169_v56 }
  0x49   : > { %v311_v29 = vadd.f32 %v303_v15, %v291_v55  ;;  %v213_v5 = vmul.f32 0.24040814, %v206_v19  ;;  %v1784_v6 = vsel %vm385_vm5, %v388_v12, %v347_v26  ;;  %v373_v34 = vrot.slane %v291_v55, 2 }
  0x4a   : > { %v246_v39 = vmul.f32 0.078250125, %v235_v22  ;;  %v272_v7 = vsel %vm265_vm3, %v263_v13, %v259_v11  ;;  %518 = vrot.lane.b32.xlu1 %v1784_v6, %s1499_s17  ;;  %v188_v10 = vadd.f32 %v180_v30, %v153_v63  ;;  %v282_v43 = vadd.f32 %v274_v60, %v249_v17 }
  0x4b   : > { %v327_v8 = vadd.f32 %v319_v61, %v311_v29  ;;  %v353_v9 = vadd.f32 %v311_v29, %v148_v14  ;;  %v279_v40 = vmul.f32 0.078250125, %v272_v7  ;;  %v1795_v44 = vadd.s32 8, %v1622_v1 }
  0x4c   : > { %v401_v46 = vmul.f32 0.078250125, %v1628_v3  ;;  %v405_v2 = vmul.f32 0.24040814, %v1628_v3  ;;  %v221_v49 = vadd.f32 %v213_v5, %v188_v10  ;;  %v429_v50 = vrot.slane %v153_v63, 2 }
  0x4d   : > { %v331_v47 = vadd.f32 %v327_v8, %v303_v15  ;;  %v365_v48 = vadd.f32 %v357_v16, %v353_v9  ;;  %v151_v52 = vmul.f32 0.36268348, %v1667_v21  ;;  %vm468_vm6 = vcmp.eq.s32.totalorder %v1795_v44, 14 }
  0x4e   : > { %v413_v11 = vrot.slane %v405_v2, 1  ;;  %v441_v13 = vrot.slane %v405_v2, 3  ;;  %v457_v51 = vrot.slane %v401_v46, 2  ;;  %v254_v57 = vadd.f32 %v246_v39, %v221_v49 }
  0x4f   : > { %v335_v14 = vadd.f32 %v331_v47, %v291_v55  ;;  %v381_v54 = vadd.f32 %v373_v34, %v365_v48  ;;  %vm490_vm7 = vcmp.eq.s32.totalorder %v1795_v44, 15  ;;  %v168_v3 = vsel %vm166_vm0, %v157_v32, %v161_v33  ;;  %v1864_v47 = vld [vmem:[%s1615_s24 + $0x30] sm:$0xff] }
  0x50   : > { %v421_v59 = vadd.f32 %v413_v11, %v401_v46  ;;  %v205_v55 = vsel %vm199_vm1, %v196_v36, %v192_v35  ;;  %v234_v60 = vsel %vm232_vm2, %v225_v37, %v229_v41  ;;  %v287_v4 = vadd.f32 %v279_v40, %v254_v57 }
  0x51   : > { %v341_v61 = vperm.slane %v335_v14, 2  ;;  %v387_v63 = vperm.slane %v381_v54, 1  ;;  %v178_v12 = vmul.f32 0.24040814, %v168_v3  ;;  %v211_v32 = vmul.f32 0.24040814, %v205_v55 }
  0x52   : > { %v437_v15 = vadd.f32 %v429_v50, %v421_v59  ;;  %v244_v33 = vmul.f32 0.078250125, %v234_v60  ;;  %v271_v35 = vsel %vm265_vm3, %v262_v53, %v258_v45  ;;  %v400_v37 = vmul.f32 0.078250125, %v1667_v21 }
  0x53   : > { %v345_v36 = vsel %vm339_vm4, %v341_v61, %v282_v43  ;;  %v186_v16 = vadd.f32 %v178_v12, %v151_v52  ;;  %v277_v17 = vmul.f32 0.078250125, %v271_v35  ;;  %v404_v20 = vmul.f32 0.24040814, %v1667_v21 }
  0x54   : > { %v1831_v41 = vsel %vm385_vm5, %v387_v63, %v345_v36  ;;  %v449_v56 = vadd.f32 %v441_v13, %v437_v15  ;;  %v483_v19 = vadd.f32 %v437_v15, %v413_v11  ;;  %v428_v45 = vrot.slane %v151_v52, 2  ;;  %v1873_v11 = vld [vmem:[%s1615_s24 + $0x38] sm:$0xff] }
  0x55   : > { %512 = vrot.lane.b32.xlu0 %v1831_v41, %s1499_s17  ;;  %v219_v22 = vadd.f32 %v211_v32, %v186_v16  ;;  %v456_v53 = vrot.slane %v400_v37, 2  ;;  %v149_v26 = vmul.f32 0.36268348, %v1716_v62  ;;  %v412_v5 = vrot.slane %v404_v20, 1 }
  0x56   : > { %v465_v29 = vadd.f32 %v457_v51, %v449_v56  ;;  %v487_v30 = vadd.f32 %v483_v19, %v401_v46  ;;  %v440_v34 = vrot.slane %v404_v20, 3  ;;  %v167_v21 = vsel %vm166_vm0, %v156_v18, %v160_v23 }
  0x57   : > { %v252_v39 = vadd.f32 %v244_v33, %v219_v22  ;;  %v204_v7 = vsel %vm199_vm1, %v195_v27, %v191_v24  ;;  %v233_v8 = vsel %vm232_vm2, %v224_v28, %v228_v38  ;;  %v420_v40 = vadd.f32 %v412_v5, %v400_v37 }
  0x58   : > { %v471_v9 = vperm.slane %v465_v29, 4  ;;  %v493_v10 = vperm.slane %v487_v30, 5  ;;  %v176_v43 = vmul.f32 0.24040814, %v167_v21  ;;  %v209_v23 = vmul.f32 0.24040814, %v204_v7 }
  0x59   : > { %v285_v18 = vadd.f32 %v277_v17, %v252_v39  ;;  %v242_v46 = vmul.f32 0.078250125, %v233_v8  ;;  %v270_v24 = vsel %vm265_vm3, %v261_v31, %v257_v42  ;;  %v436_v2 = vadd.f32 %v428_v45, %v420_v40 }
  0x5a   : > { %v478_v27 = vsel %vm468_vm6, %v471_v9, %v287_v4  ;;  %v184_v28 = vadd.f32 %v176_v43, %v149_v26  ;;  %v275_v38 = vmul.f32 0.078250125, %v270_v24  ;;  %v399_v49 = vmul.f32 0.078250125, %v1716_v62 }
  0x5b   : > { %v1868_v48 = vsel %vm490_vm7, %v493_v10, %v478_v27  ;;  %v403_v58 = vmul.f32 0.24040814, %v1716_v62  ;;  %v427_v50 = vrot.slane %v149_v26, 2  ;;  %v448_v42 = vadd.f32 %v440_v34, %v436_v2 }
  0x5c   : > { %527 = vrot.lane.b32.xlu2 %v1868_v48, %s1499_s17  ;;  %v482_v31 = vadd.f32 %v436_v2, %v412_v5  ;;  %v217_v13 = vadd.f32 %v209_v23, %v184_v28  ;;  %v155_v51 = vmul.f32 0.36268348, %v1873_v11  ;;  %v455_v54 = vrot.slane %v399_v49, 2 }
  0x5d   : > { %v411_v52 = vrot.slane %v403_v58, 1  ;;  %v439_v14 = vrot.slane %v403_v58, 3  ;;  %v159_v57 = vrot.slane %v1864_v47, 7  ;;  %v464_v59 = vadd.f32 %v456_v53, %v448_v42 }
  0x5e   : > { %v486_v3 = vadd.f32 %v482_v31, %v400_v37  ;;  %v250_v55 = vadd.f32 %v242_v46, %v217_v13  ;;  %v163_v62 = vrot.slane %v1873_v11, 7  ;;  %v194_v61 = vrot.slane %v1864_v47, 1 }
  0x5f   : > { %v419_v60 = vadd.f32 %v411_v52, %v399_v49  ;;  %v198_v63 = vrot.slane %v1873_v11, 1  ;;  %v227_v4 = vrot.slane %v1864_v47, 6  ;;  %v470_v12 = vperm.slane %v464_v59, 4 }
  0x60   : > { %v492_v15 = vperm.slane %v486_v3, 5  ;;  %v283_v32 = vadd.f32 %v275_v38, %v250_v55  ;;  %v170_v33 = vsel %vm166_vm0, %v159_v57, %v163_v62  ;;  %v231_v17 = vrot.slane %v1873_v11, 6 }
  0x61   : > { %v435_v35 = vadd.f32 %v427_v50, %v419_v60  ;;  %v182_v36 = vmul.f32 0.24040814, %v170_v33  ;;  %v207_v16 = vsel %vm199_vm1, %v198_v63, %v194_v61  ;;  %v476_v37 = vsel %vm468_vm6, %v470_v12, %v285_v18 }
  0x62   : > { %v215_v56 = vmul.f32 0.24040814, %v207_v16  ;;  %v260_v19 = vrot.slane %v1864_v47, 2  ;;  %v264_v20 = vrot.slane %v1873_v11, 2  ;;  %v1894_v22 = vsel %vm490_vm7, %v492_v15, %v476_v37 }
  0x63   : > { %v447_v45 = vadd.f32 %v439_v14, %v435_v35  ;;  %v481_v53 = vadd.f32 %v435_v35, %v411_v52  ;;  %v190_v26 = vadd.f32 %v182_v36, %v155_v51  ;;  %521 = vrot.lane.b32.xlu1 %v1894_v22, %s1499_s17  ;;  %v236_v29 = vsel %vm232_vm2, %v227_v4, %v231_v17 }
  0x64   : > { %v273_v30 = vsel %vm265_vm3, %v264_v20, %v260_v19  ;;  %v402_v5 = vmul.f32 0.078250125, %v1873_v11  ;;  %v406_v34 = vmul.f32 0.24040814, %v1873_v11  ;;  %v248_v8 = vmul.f32 0.078250125, %v236_v29 }
  0x65   : > { %v463_v39 = vadd.f32 %v455_v54, %v447_v45  ;;  %v485_v21 = vadd.f32 %v481_v53, %v399_v49  ;;  %v223_v7 = vadd.f32 %v215_v56, %v190_v26  ;;  %v281_v9 = vmul.f32 0.078250125, %v273_v30 }
  0x66   : > { %v414_v10 = vrot.slane %v406_v34, 1  ;;  %v430_v40 = vrot.slane %v155_v51, 2  ;;  %v442_v46 = vrot.slane %v406_v34, 3  ;;  %v458_v27 = vrot.slane %v402_v5, 2 }
  0x67   : > { %v469_v43 = vperm.slane %v463_v39, 4  ;;  %v491_v18 = vperm.slane %v485_v21, 5  ;;  %v256_v23 = vadd.f32 %v248_v8, %v223_v7  ;;  %v1905_v2 = vmul.f32 0.24040814, %v1784_v6 }
  0x68   : > { %v422_v24 = vadd.f32 %v414_v10, %v402_v5  ;;  %v174_v28 = vsel %vm166_vm0, %v163_v62, %v159_v57  ;;  %v154_v49 = vmul.f32 0.36268348, %v1864_v47  ;;  %v203_v50 = vsel %vm199_vm1, %v194_v61, %v198_v63 }
  0x69   : > { %v474_v38 = vsel %vm468_vm6, %v469_v43, %v283_v32  ;;  %v181_v58 = vmul.f32 0.24040814, %v174_v28  ;;  %750 = vrot.lane.b32.xlu2 %v1905_v2, %s1500_s25  ;;  %v214_v31 = vmul.f32 0.24040814, %v203_v50  ;;  %v240_v13 = vsel %vm232_vm2, %v231_v17, %v227_v4 }
  0x6a   : > { %v1916_v11 = vsel %vm490_vm7, %v491_v18, %v474_v38  ;;  %v438_v42 = vadd.f32 %v430_v40, %v422_v24  ;;  %v289_v51 = vadd.f32 %v281_v9, %v256_v23  ;;  %v294_v57 = vmul.f32 0.078250125, %v1864_v47 }
  0x6b   : > { %515 = vrot.lane.b32.xlu0 %v1916_v11, %s1499_s17  ;;  %v189_v52 = vadd.f32 %v181_v58, %v154_v49  ;;  %v298_v59 = vmul.f32 0.24040814, %v1864_v47  ;;  %v247_v55 = vmul.f32 0.078250125, %v240_v13  ;;  %v269_v62 = vsel %vm265_vm3, %v260_v19, %v264_v20 }
  0x6c   : > { %v450_v14 = vadd.f32 %v442_v46, %v438_v42  ;;  %v484_v54 = vadd.f32 %v438_v42, %v414_v10  ;;  %v322_v60 = vrot.slane %v154_v49, 6  ;;  %v1929_v12 = vmul.f32 0.24040814, %v1868_v48 }
  0x6d   : > { %v222_v3 = vadd.f32 %v214_v31, %v189_v52  ;;  %v306_v4 = vrot.slane %v298_v59, 7  ;;  %v360_v35 = vrot.slane %v298_v59, 1  ;;  %v280_v36 = vmul.f32 0.078250125, %v269_v62 }
  0x6e   : > { %v466_v61 = vadd.f32 %v458_v27, %v450_v14  ;;  %v488_v63 = vadd.f32 %v484_v54, %v402_v5  ;;  %v376_v16 = vrot.slane %v294_v57, 2  ;;  %v1942_v30 = vmul.f32 0.36268348, %v1831_v41 }
  0x6f   : > { %v314_v33 = vadd.f32 %v306_v4, %v294_v57  ;;  %v255_v17 = vadd.f32 %v247_v55, %v222_v3  ;;  %v1945_v39 = vmul.f32 0.24040814, %v1916_v11  ;;  %v1960_v7 = vmul.f32 0.36268348, %v1894_v22 }
  0x70   : > { %v472_v15 = vperm.slane %v466_v61, 4  ;;  %v494_v32 = vperm.slane %v488_v63, 5  ;;  %v1963_v8 = vmul.f32 0.24040814, %v1831_v41  ;;  %v1966_v9 = vmul.f32 0.24040814, %v1726_v25 }
  0x71   : > { %v330_v37 = vadd.f32 %v322_v60, %v314_v33  ;;  %v356_v56 = vadd.f32 %v314_v33, %v154_v49  ;;  %756 = vrot.lane.b32.xlu2 %v1929_v12, %s1500_s25  ;;  %v288_v53 = vadd.f32 %v280_v36, %v255_v17  ;;  %v1978_v10 = vmul.f32 0.24040814, %v1894_v22 }
  0x72   : > { %v480_v47 = vsel %vm468_vm6, %v472_v15, %v289_v51  ;;  %v1993_v18 = vmul.f32 0.36268348, %v1784_v6  ;;  %v2002_v23 = vmul.f32 0.36268348, %v1916_v11  ;;  %v2005_v46 = vmul.f32 0.36268348, %v1868_v48 }
  0x73   : > { %v1937_v19 = vsel %vm490_vm7, %v494_v32, %v480_v47  ;;  %v334_v20 = vadd.f32 %v330_v37, %v306_v4  ;;  %v368_v45 = vadd.f32 %v360_v35, %v356_v56  ;;  %v2014_v24 = vmul.f32 0.36268348, %v1726_v25 }
  0x74   : > { %533 = vrot.lane.b32.xlu1 %v1937_v19, %s1499_s17  ;;  %v1981_v40 = vmul.f32 0.24040814, %v1937_v19  ;;  %v2023_v27 = vmul.f32 0.36268348, %v1937_v19  ;;  %v2030_v28 = vmul.f32 0.078250125, %v1784_v6 }
  0x75   : > { %v338_v26 = vadd.f32 %v334_v20, %v294_v57  ;;  %v384_v29 = vadd.f32 %v376_v16, %v368_v45  ;;  %v2035_v38 = vmul.f32 0.078250125, %v1868_v48  ;;  %v2044_v49 = vmul.f32 0.078250125, %v1916_v11 }
  0x76   : > { %v2051_v58 = vmul.f32 0.078250125, %v1831_v41  ;;  %v2054_v50 = vmul.f32 0.078250125, %v1726_v25  ;;  %v2061_v51 = vmul.f32 0.078250125, %v1894_v22 }
  0x77   : > { %v344_v5 = vperm.slane %v338_v26, 2  ;;  %v390_v34 = vperm.slane %v384_v29, 1  ;;  %v1504_v63 = vmov 2   ;;  %vm1206_vm13 = vcmask 130048  }
  0x78   : > { %1387 = vset.pattern.permute.xlu1 %v1504_v63  ;;  %1389 = vset.pattern.permute.xlu0 %v1504_v63 }
  0x79   : > { %v351_v44 = vsel %vm339_vm4, %v344_v5, %v288_v53  ;;  %786 = vrot.lane.b32.xlu2 %v1942_v30, %s1501_s26 }
  0x7a   : > { %v1953_v21 = vsel %vm385_vm5, %v390_v34, %v351_v44  ;;  %1388 = vset.pattern.permute.xlu2 %v1504_v63 }
  0x7b   : > { %530 = vrot.lane.b32.xlu0 %v1953_v21, %s1499_s17  ;;  %v1975_v1 = vmul.f32 0.36268348, %v1953_v21  ;;  %v1990_v43 = vmul.f32 0.24040814, %v1953_v21 }
  0x7c   : > { %748 = vrot.lane.b32.xlu1 %v1945_v39, %s1500_s25 }
  0x81   : > { %792 = vrot.lane.b32.xlu2 %v1960_v7, %s1501_s26 }
  0x83   : > { %746 = vrot.lane.b32.xlu0 %v1963_v8, %s1500_s25 }
  0x84   : > { %754 = vrot.lane.b32.xlu1 %v1966_v9, %s1500_s25 }
  0x89   : > { %798 = vrot.lane.b32.xlu2 %v1975_v1, %s1501_s26 }
  0x8b   : > { %752 = vrot.lane.b32.xlu0 %v1978_v10, %s1500_s25 }
  0x8c   : > { %760 = vrot.lane.b32.xlu1 %v1981_v40, %s1500_s25 }
  0x91   : > { %893 = vrot.lane.b32.xlu2 %v1945_v39, %s1502_s27 }
  0x93   : > { %758 = vrot.lane.b32.xlu0 %v1990_v43, %s1500_s25 }
  0x94   : > { %790 = vrot.lane.b32.xlu1 %v1993_v18, %s1501_s26 }
  0x99   : > { %899 = vrot.lane.b32.xlu2 %v1966_v9, %s1502_s27 }
  0x9b   : > { %788 = vrot.lane.b32.xlu0 %v2002_v23, %s1501_s26  ;;  %v525_v42 = vpop.permute.xlu2 %524 }
  0x9c   : > { %796 = vrot.lane.b32.xlu1 %v2005_v46, %s1501_s26  ;;  %v526_v15 = vsel %vm511_vm8, %v525_v42, %v1726_v25 }
  0xa1   : > { %905 = vrot.lane.b32.xlu2 %v1981_v40, %s1502_s27 }
  0xa3   : > { %794 = vrot.lane.b32.xlu0 %v2014_v24, %s1501_s26 }
  0xa4   : > { %891 = vrot.lane.b32.xlu1 %v1963_v8, %s1502_s27 }
  0xa9   : > { %935 = vrot.lane.b32.xlu2 %v2030_v28, %s1503_s28 }
  0xab   : > { %800 = vrot.lane.b32.xlu0 %v2023_v27, %s1501_s26 }
  0xac   : > { %897 = vrot.lane.b32.xlu1 %v1978_v10, %s1502_s27 }
  0xb1   : > { %941 = vrot.lane.b32.xlu2 %v2035_v38, %s1503_s28 }
  0xb3   : > { %895 = vrot.lane.b32.xlu0 %v1905_v2, %s1502_s27 }
  0xb4   : > { %903 = vrot.lane.b32.xlu1 %v1990_v43, %s1502_s27 }
  0xb6   : > { %v528_v54 = vpop.permute.xlu2 %527 }
  0xb7   : > { %v529_v57 = vsel %vm511_vm8, %v528_v54, %v1868_v48 }
  0xbb   : > { %901 = vrot.lane.b32.xlu0 %v1929_v12, %s1502_s27 }
  0xbc   : > { %933 = vrot.lane.b32.xlu1 %v2044_v49, %s1503_s28  ;;  %v519_v31 = vpop.permute.xlu1 %518 }
  0xbd   : > { %v520_v14 = vsel %vm511_vm8, %v519_v31, %v1784_v6 }
  0xc3   : > { %931 = vrot.lane.b32.xlu0 %v2051_v58, %s1503_s28  ;;  %v751_v3 = vpop.permute.xlu2 %750 }
  0xc4   : > { %939 = vrot.lane.b32.xlu1 %v2054_v50, %s1503_s28  ;;  %v772_v31 = vadd.f32 %v751_v3, %v2030_v28 }
  0xc7   : > { %v513_v13 = vpop.permute.xlu0 %512 }
  0xc8   : > { %v514_v52 = vsel %vm511_vm8, %v513_v13, %v1831_v41 }
  0xc9   : > { %536 = vrot.lane.b32.xlu2 %v514_v52, %s1499_s17 }
  0xcb   : > { %937 = vrot.lane.b32.xlu0 %v2061_v51, %s1503_s28  ;;  %v757_v61 = vpop.permute.xlu2 %756 }
  0xcc   : > { %540 = vrot.lane.b32.xlu1 %v520_v14, %s1499_s17 }
  0xd3   : > { %v787_v32 = vpop.permute.xlu2 %786 }
  0xd4   : > { %546 = vrot.lane.b32.xlu1 %v529_v57, %s1499_s17 }
  0xd5   : > { %v522_v59 = vpop.permute.xlu1 %521 }
  0xd6   : > { %v523_v55 = vsel %vm511_vm8, %v522_v59, %v1894_v22 }
  0xd7   : > { %542 = vrot.lane.b32.xlu2 %v523_v55, %s1499_s17 }
  0xdb   : > { %v793_v47 = vpop.permute.xlu2 %792 }
  0xdd   : > { %v516_v62 = vpop.permute.xlu0 %515 }
  0xde   : > { %v517_v60 = vsel %vm511_vm8, %v516_v62, %v1916_v11  ;;  %v2104_v62 = vadd.f32 %v757_v61, %v2035_v38 }
  0xdf   : > { %538 = vrot.lane.b32.xlu0 %v517_v60, %s1499_s17 }
  0xe3   : > { %v799_v5 = vpop.permute.xlu2 %798 }
  0xe6   : > { %v534_v4 = vpop.permute.xlu1 %533 }
  0xe7   : > { %544 = vrot.lane.b32.xlu0 %v526_v15, %s1499_s17  ;;  %v535_v36 = vsel %vm511_vm8, %v534_v4, %v1937_v19 }
  0xeb   : > { %v2100_v57 = vpop.permute.xlu2 %893 }
  0xed   : > { %v531_v33 = vpop.permute.xlu0 %530 }
  0xee   : > { %v749_v35 = vpop.permute.xlu1 %748  ;;  %v532_v16 = vsel %vm511_vm8, %v531_v33, %v1953_v21 }
  0xef   : > { %550 = vrot.lane.b32.xlu0 %v535_v36, %s1499_s17  ;;  %548 = vrot.lane.b32.xlu2 %v532_v16, %s1499_s17  ;;  %v771_v60 = vadd.f32 %v749_v35, %v2044_v49  ;;  %v2109_v16 = vmul.f32 0.078250125, %v1953_v21  ;;  %s1449_s17 = scalar_lea.hbm %s2526_s1, 128 }
  0xf0   : > { %p1451_p1 = scmp.lt.s32.totalorder %s1449_s17, %s1445_s22 }
  0xf2   : > { %p1452_p3 = por %p1451_p1, %p1450_p0 }
  0xf4   : > { %p1453_p4 = pnand %p1452_p3, %p1448_p13 }
  0xf5   : > { %v747_v17 = vpop.permute.xlu0 %746 }
  0xf6   : > { %v755_v37 = vpop.permute.xlu1 %754  ;;  %v2090_v56 = vadd.f32 %v747_v17, %v2051_v58 }
  0xf8   : > { %v810_v20 = vadd.f32 %v787_v32, %v2090_v56 }
  0xfa   : > { %v818_v45 = vadd.f32 %v810_v20, %v747_v17  ;;  %v774_v20 = vadd.f32 %v755_v37, %v2054_v50 }
  0xfc   : > { %v826_v53 = vadd.f32 %v818_v45, %v2051_v58 }
  0xfd   : > { %v753_v26 = vpop.permute.xlu0 %752 }
  0xfe   : > { %v761_v29 = vpop.permute.xlu1 %760  ;;  %v2095_v34 = vadd.f32 %v753_v26, %v2061_v51  ;;  %837 = vperm.xlu1 %1387, %v826_v53  }
 0x100   : > { %v813_v44 = vadd.f32 %v793_v47, %v2095_v34  ;;  %v2111_v47 = vpop.permute.xlu2 %899 }
 0x102   : > { %v821_v42 = vadd.f32 %v813_v44, %v753_v26 }
 0x104   : > { %v829_v13 = vadd.f32 %v821_v42, %v2061_v51 }
 0x105   : > { %v759_v52 = vpop.permute.xlu0 %758 }
 0x106   : > { %v791_v14 = vpop.permute.xlu1 %790  ;;  %852 = vperm.xlu1 %1387, %v829_v13   ;;  %v2119_v26 = vadd.f32 %v759_v52, %v2109_v16 }
 0x107   : > { %v812_v54 = vadd.f32 %v791_v14, %v772_v31 }
 0x108   : > { %v816_v42 = vadd.f32 %v799_v5, %v2119_v26 }
 0x109   : > { %v820_v59 = vadd.f32 %v812_v54, %v751_v3  ;;  %v2129_v54 = vpop.permute.xlu2 %905 }
 0x10b   : > { %v828_v55 = vadd.f32 %v820_v59, %v2030_v28 }
 0x10d   : > { %847 = vperm.xlu0 %1389, %v828_v55   ;;  %v789_v63 = vpop.permute.xlu0 %788 }
 0x10e   : > { %v797_v4 = vpop.permute.xlu1 %796  ;;  %v811_v15 = vadd.f32 %v789_v63, %v771_v60  ;;  %v1505_v63 = vmov 1  }
 0x10f   : > { %v815_v32 = vadd.f32 %v797_v4, %v2104_v62  ;;  %v824_v4 = vadd.f32 %v816_v42, %v759_v52 }
 0x110   : > { %v819_v33 = vadd.f32 %v811_v15, %v749_v35  ;;  %v2122_v35 = vmul.f32 0.078250125, %v1937_v19 }
 0x111   : > { %v823_v36 = vadd.f32 %v815_v32, %v757_v61  ;;  %v832_v15 = vadd.f32 %v824_v4, %v2109_v16 }
 0x112   : > { %v827_v3 = vadd.f32 %v819_v33, %v2044_v49  ;;  %v2127_v14 = vadd.f32 %v761_v29, %v2122_v35  ;;  %v885_v33 = vadd.f32 %v772_v31, %v1993_v18 }
 0x113   : > { %v831_v17 = vadd.f32 %v823_v36, %v2035_v38  ;;  %v2139_v36 = vpop.permute.xlu2 %935 }
 0x114   : > { %842 = vperm.xlu2 %1388, %v827_v3   ;;  %v890_v0 = vadd.f32 %v2127_v14, %v2023_v27 }
 0x115   : > { %862 = vperm.xlu1 %1387, %v831_v17   ;;  %v795_v45 = vpop.permute.xlu0 %794 }
 0x116   : > { %v2116_v53 = vpop.permute.xlu1 %891  ;;  %v814_v61 = vadd.f32 %v795_v45, %v774_v20 }
 0x118   : > { %v822_v44 = vadd.f32 %v814_v61, %v755_v37 }
 0x11a   : > { %v830_v13 = vadd.f32 %v822_v44, %v2054_v50 }
 0x11c   : > { %857 = vperm.xlu2 %1388, %v830_v13   ;;  %v883_v13 = vadd.f32 %v2090_v56, %v1942_v30  ;;  %v886_v56 = vadd.f32 %v2095_v34, %v1960_v7 }
 0x11d   : > { %945 = vrot.lane.b32.xlu1 %v2122_v35, %s1503_s28  ;;  %v801_v59 = vpop.permute.xlu0 %800 }
 0x11e   : > { %v2133_v55 = vpop.permute.xlu1 %897  ;;  %1392 = vset.pattern.permute.xlu1 %v1505_v63  ;;  %v817_v37 = vadd.f32 %v801_v59, %v2127_v14  ;;  %v887_v59 = vadd.f32 %v774_v20, %v2014_v24  ;;  %v915_v4 = vadd.f32 %v2116_v53, %v883_v13 }
 0x11f   : > { %v918_v20 = vadd.f32 %v2133_v55, %v886_v56 }
 0x120   : > { %v825_v5 = vadd.f32 %v817_v37, %v761_v29  ;;  %v884_v29 = vadd.f32 %v771_v60, %v2002_v23  ;;  %v919_v60 = vadd.f32 %v2111_v47, %v887_v59 }
 0x122   : > { %v833_v32 = vadd.f32 %v825_v5, %v2122_v35  ;;  %v916_v44 = vadd.f32 %v2100_v57, %v884_v29  ;;  %v2176_v29 = vpop.permute.xlu2 %941 }
 0x123   : > { %2536 = vst [vmem:[#allocation9_spill] sm:$0xff] %v2176_v29 }
 0x124   : > { %872 = vperm.xlu0 %1389, %v833_v32   ;;  %867 = vperm.xlu2 %1388, %v832_v15  }
 0x125   : > { %v2141_v3 = vpop.permute.xlu0 %895 }
 0x126   : > { %v2143_v17 = vpop.permute.xlu1 %903  ;;  %v917_v45 = vadd.f32 %v2141_v3, %v885_v33 }
 0x128   : > { %v957_v52 = vadd.f32 %v2139_v36, %v917_v45  ;;  %v888_v45 = vadd.f32 %v2104_v62, %v2005_v46 }
 0x12a   : > { %976 = vperm.xlu1 %1392, %v957_v52  }
 0x12c   : > { %943 = vrot.lane.b32.xlu0 %v2109_v16, %s1503_s28  ;;  %1390 = vset.pattern.permute.xlu2 %v1505_v63 }
 0x12d   : > { %v2150_v31 = vpop.permute.xlu0 %901  ;;  %1391 = vset.pattern.permute.xlu0 %v1505_v63 }
 0x12e   : > { %v2152_v61 = vpop.permute.xlu1 %933  ;;  %v920_v52 = vadd.f32 %v2150_v31, %v888_v45 }
 0x12f   : > { %v956_v42 = vadd.f32 %v2152_v61, %v916_v44 }
 0x130   : > { %v960_v44 = vadd.f32 %v2176_v29, %v920_v52  ;;  %v537_v52 = vpop.permute.xlu2 %536 }
 0x134   : > { %971 = vperm.xlu0 %1391, %v956_v42  }
 0x135   : > { %v2161_v37 = vpop.permute.xlu0 %931 }
 0x136   : > { %v2163_v5 = vpop.permute.xlu1 %939  ;;  %v955_v63 = vadd.f32 %v2161_v37, %v915_v4 }
 0x137   : > { %2535 = vst [vmem:[#allocation8_spill] sm:$0xff] %v2163_v5  ;;  %v959_v15 = vadd.f32 %v2163_v5, %v919_v60 }
 0x138   : > { %966 = vperm.xlu2 %1390, %v955_v63  }
 0x139   : > { %986 = vperm.xlu1 %1392, %v959_v15  }
 0x13d   : > { %v2170_v32 = vpop.permute.xlu0 %937 }
 0x13e   : > { %v958_v33 = vadd.f32 %v2170_v32, %v918_v20  ;;  %v541_v15 = vpop.permute.xlu1 %540 }
 0x140   : > { %981 = vperm.xlu2 %1390, %v958_v33  }
 0x146   : > { %v547_v20 = vpop.permute.xlu1 %546 }
 0x148   : > { %991 = vperm.xlu2 %1390, %v960_v44  }
 0x150   : > { %1020 = vrot.lane.b32.xlu2 %v1942_v30, %s1503_s28 }
 0x151   : > { %v539_v34 = vpop.permute.xlu0 %538 }
 0x152   : > { %v553_v42 = vsel %vm511_vm8, %v539_v34, %v1916_v11  ;;  %v554_v11 = vsel %vm511_vm8, %v541_v15, %v1784_v6  ;;  %v543_v6 = vpop.permute.xlu2 %542 }
 0x153   : > { %v561_v13 = vmul.f32 0.24040814, %v553_v42  ;;  %v562_v33 = vmul.f32 0.24040814, %v554_v11 }
 0x158   : > { %578 = vrot.lane.b32.xlu2 %v561_v13, %s1506_s29 }
 0x159   : > { %v545_v62 = vpop.permute.xlu0 %544 }
 0x15a   : > { %v556_v59 = vsel %vm511_vm8, %v545_v62, %v1726_v25  ;;  %v557_v25 = vsel %vm511_vm8, %v547_v20, %v1868_v48  ;;  %v549_v20 = vpop.permute.xlu2 %548 }
 0x15b   : > { %v564_v60 = vmul.f32 0.24040814, %v556_v59  ;;  %v565_v44 = vmul.f32 0.24040814, %v557_v25  ;;  %v644_v14 = vmul.f32 0.078250125, %v556_v59 }
 0x160   : > { %584 = vrot.lane.b32.xlu2 %v564_v60, %s1506_s29 }
 0x161   : > { %v551_v4 = vpop.permute.xlu0 %550 }
 0x162   : > { %v559_v63 = vsel %vm511_vm8, %v551_v4, %v1937_v19  ;;  %v552_v19 = vsel %vm511_vm8, %v537_v52, %v1831_v41  ;;  %v555_v4 = vsel %vm511_vm8, %v543_v6, %v1894_v22  ;;  %v558_v41 = vsel %vm511_vm8, %v549_v20, %v1953_v21 }
 0x163   : > { %v567_v56 = vmul.f32 0.24040814, %v559_v63  ;;  %v640_v34 = vmul.f32 0.078250125, %v552_v19  ;;  %v643_v48 = vmul.f32 0.078250125, %v555_v4  ;;  %v922_v52 = vadd.f32 %v2129_v54, %v890_v0 }
 0x164   : > { %v641_v6 = vmul.f32 0.078250125, %v553_v42  ;;  %v560_v5 = vmul.f32 0.24040814, %v552_v19  ;;  %v889_v0 = vadd.f32 %v2119_v26, %v1975_v1  ;;  %v647_v42 = vmul.f32 0.078250125, %v559_v63 }
 0x165   : > { %v566_v19 = vmul.f32 0.24040814, %v558_v41  ;;  %v642_v63 = vmul.f32 0.078250125, %v554_v11 }
 0x166   : > { %v921_v21 = vadd.f32 %v2143_v17, %v889_v0 }
 0x168   : > { %590 = vrot.lane.b32.xlu2 %v567_v56, %s1506_s29 }
 0x170   : > { %612 = vrot.lane.b32.xlu2 %v562_v33, %s1502_s27  ;;  %v2195_v45 = vpop.permute.xlu1 %837 }
 0x171   : > { %2537 = vst [vmem:[#allocation10_spill] sm:$0xff] %v2195_v45 }
 0x178   : > { %618 = vrot.lane.b32.xlu2 %v565_v44, %s1502_s27  ;;  %v2200_v62 = vpop.permute.xlu1 %852 }
 0x179   : > { %2538 = vst [vmem:[#allocation11_spill] sm:$0xff] %v2200_v62  ;;  %v646_v62 = vmul.f32 0.078250125, %v558_v41 }
 0x17f   : > { %v2213_v45 = vpop.permute.xlu0 %847 }
 0x180   : > { %656 = vrot.lane.b32.xlu2 %v640_v34, %s1507_s30  ;;  %2540 = vst [vmem:[#allocation13_spill] sm:$0xff] %v2213_v45 }
 0x187   : > { %v2205_v15 = vpop.permute.xlu1 %862 }
 0x188   : > { %2539 = vst [vmem:[#allocation12_spill] sm:$0xff] %v2205_v15  ;;  %662 = vrot.lane.b32.xlu2 %v643_v48, %s1507_s30 }
 0x18f   : > { %v2215_v29 = vpop.permute.xlu1 %945 }
 0x190   : > { %v962_v22 = vadd.f32 %v2215_v29, %v922_v52  ;;  %668 = vrot.lane.b32.xlu2 %v646_v62, %s1507_s30  ;;  %v563_v52 = vmul.f32 0.24040814, %v555_v4 }
 0x192   : > { %1001 = vperm.xlu1 %1392, %v962_v22   ;;  %v2231_v22 = vpop.permute.xlu2 %842 }
 0x196   : > { %v2219_v15 = vpop.permute.xlu0 %872 }
 0x198   : > { %690 = vrot.lane.b32.xlu2 %v641_v6, %s1503_s28 }
 0x19a   : > { %576 = vrot.lane.b32.xlu1 %v560_v5, %s1506_s29  ;;  %v2240_v26 = vpop.permute.xlu2 %857 }
 0x19e   : > { %v2226_v20 = vpop.permute.xlu0 %943 }
 0x19f   : > { %v961_v45 = vadd.f32 %v2226_v20, %v921_v21 }
 0x1a0   : > { %696 = vrot.lane.b32.xlu2 %v644_v14, %s1503_s28 }
 0x1a1   : > { %996 = vperm.xlu0 %1391, %v961_v45  }
 0x1a2   : > { %582 = vrot.lane.b32.xlu1 %v563_v52, %s1506_s29  ;;  %v2246_v59 = vpop.permute.xlu2 %867 }
 0x1a3   : > { %2541 = vst [vmem:[#allocation14_spill] sm:$0xff] %v2246_v59 }
 0x1a8   : > { %702 = vrot.lane.b32.xlu2 %v647_v42, %s1503_s28 }
 0x1a9   : > { %580 = vrot.lane.b32.xlu0 %v562_v33, %s1506_s29 }
 0x1aa   : > { %588 = vrot.lane.b32.xlu1 %v566_v19, %s1506_s29 }
 0x1b0   : > { %1026 = vrot.lane.b32.xlu2 %v1960_v7, %s1503_s28 }
 0x1b1   : > { %586 = vrot.lane.b32.xlu0 %v565_v44, %s1506_s29 }
 0x1b2   : > { %610 = vrot.lane.b32.xlu1 %v561_v13, %s1502_s27  ;;  %v2252_v13 = vpop.permute.xlu2 %966 }
 0x1b3   : > { %2542 = vst [vmem:[#allocation15_spill] sm:$0xff] %v2252_v13 }
 0x1b8   : > { %1032 = vrot.lane.b32.xlu2 %v1975_v1, %s1503_s28 }
 0x1b9   : > { %608 = vrot.lane.b32.xlu0 %v560_v5, %s1502_s27 }
 0x1ba   : > { %616 = vrot.lane.b32.xlu1 %v564_v60, %s1502_s27  ;;  %v2258_v5 = vpop.permute.xlu2 %981  ;;  %v645_v60 = vmul.f32 0.078250125, %v557_v25 }
 0x1bb   : > { %2543 = vst [vmem:[#allocation16_spill] sm:$0xff] %v2258_v5 }
 0x1c0   : > { %1054 = vrot.lane.b32.xlu2 %v1945_v39, %s1508_s2 }
 0x1c1   : > { %614 = vrot.lane.b32.xlu0 %v563_v52, %s1502_s27 }
 0x1c2   : > { %622 = vrot.lane.b32.xlu1 %v567_v56, %s1502_s27  ;;  %v2264_v39 = vpop.permute.xlu2 %991  ;;  %v2277_v56 = vpop.permute.xlu1 %976 }
 0x1c3   : > { %2544 = vst [vmem:[#allocation17_spill] sm:$0xff] %v2264_v39 }
 0x1c8   : > { %1060 = vrot.lane.b32.xlu2 %v1966_v9, %s1508_s2 }
 0x1c9   : > { %620 = vrot.lane.b32.xlu0 %v566_v19, %s1502_s27 }
 0x1ca   : > { %660 = vrot.lane.b32.xlu1 %v642_v63, %s1507_s30  ;;  %v2270_v9 = vpop.permute.xlu2 %1020  ;;  %v2283_v33 = vpop.permute.xlu1 %986 }
 0x1d0   : > { %1066 = vrot.lane.b32.xlu2 %v1981_v40, %s1508_s2 }
 0x1d1   : > { %658 = vrot.lane.b32.xlu0 %v641_v6, %s1507_s30 }
 0x1d2   : > { %666 = vrot.lane.b32.xlu1 %v645_v60, %s1507_s30  ;;  %v579_v40 = vpop.permute.xlu2 %578 }
 0x1d9   : > { %664 = vrot.lane.b32.xlu0 %v644_v14, %s1507_s30 }
 0x1da   : > { %688 = vrot.lane.b32.xlu1 %v640_v34, %s1503_s28  ;;  %v585_v11 = vpop.permute.xlu2 %584  ;;  %v972_v34 = vpop.permute.xlu0 %971 }
 0x1e1   : > { %670 = vrot.lane.b32.xlu0 %v647_v42, %s1507_s30 }
 0x1e2   : > { %694 = vrot.lane.b32.xlu1 %v643_v48, %s1503_s28  ;;  %v591_v25 = vpop.permute.xlu2 %590 }
 0x1e9   : > { %692 = vrot.lane.b32.xlu0 %v642_v63, %s1503_s28 }
 0x1ea   : > { %700 = vrot.lane.b32.xlu1 %v646_v62, %s1503_s28  ;;  %v613_v44 = vpop.permute.xlu2 %612 }
 0x1f1   : > { %698 = vrot.lane.b32.xlu0 %v645_v60, %s1503_s28 }
 0x1f2   : > { %1024 = vrot.lane.b32.xlu1 %v1993_v18, %s1503_s28  ;;  %v619_v4 = vpop.permute.xlu2 %618 }
 0x1f9   : > { %1022 = vrot.lane.b32.xlu0 %v2002_v23, %s1503_s28 }
 0x1fa   : > { %1030 = vrot.lane.b32.xlu1 %v2005_v46, %s1503_s28  ;;  %v657_v0 = vpop.permute.xlu2 %656 }
 0x201   : > { %1028 = vrot.lane.b32.xlu0 %v2014_v24, %s1503_s28 }
 0x202   : > { %1052 = vrot.lane.b32.xlu1 %v1963_v8, %s1508_s2  ;;  %v663_v42 = vpop.permute.xlu2 %662 }
 0x204   : > { %v2289_v45 = vpop.permute.xlu1 %1001 }
 0x205   : > { %2545 = vst [vmem:[#allocation18_spill] sm:$0xff] %v2289_v45 }
 0x209   : > { %1034 = vrot.lane.b32.xlu0 %v2023_v27, %s1503_s28 }
 0x20a   : > { %1058 = vrot.lane.b32.xlu1 %v1978_v10, %s1508_s2  ;;  %v601_v10 = vadd.f32 %v579_v40, %v2002_v23  ;;  %v669_v39 = vpop.permute.xlu2 %668 }
 0x20c   : > { %v577_v62 = vpop.permute.xlu1 %576 }
 0x211   : > { %1056 = vrot.lane.b32.xlu0 %v1905_v2, %s1508_s2  ;;  %v604_v2 = vadd.f32 %v585_v11, %v2014_v24 }
 0x212   : > { %1064 = vrot.lane.b32.xlu1 %v1990_v43, %s1508_s2  ;;  %v600_v43 = vadd.f32 %v577_v62, %v1942_v30 }
 0x213   : > { %v2299_v48 = vpop.permute.xlu0 %996 }
 0x214   : > { %2546 = vst [vmem:[#allocation19_spill] sm:$0xff] %v2299_v48  ;;  %v583_v8 = vpop.permute.xlu1 %582 }
 0x215   : > { %v603_v59 = vadd.f32 %v583_v8, %v1960_v7 }
 0x219   : > { %1062 = vrot.lane.b32.xlu0 %v1929_v12, %s1508_s2  ;;  %v607_v12 = vadd.f32 %v591_v25, %v2023_v27 }
 0x21b   : > { %v581_v41 = vpop.permute.xlu0 %580 }
 0x21c   : > { %v589_v6 = vpop.permute.xlu1 %588 }
 0x21d   : > { %v606_v24 = vadd.f32 %v589_v6, %v1975_v1 }
 0x223   : > { %v587_v21 = vpop.permute.xlu0 %586 }
 0x224   : > { %v611_v14 = vpop.permute.xlu1 %610 }
 0x225   : > { %v633_v52 = vadd.f32 %v611_v14, %v601_v10  ;;  %v602_v10 = vadd.f32 %v581_v41, %v1993_v18  ;;  %v691_v14 = vpop.permute.xlu2 %690 }
 0x227   : > { %v634_v11 = vadd.f32 %v613_v44, %v602_v10 }
 0x22b   : > { %v609_v19 = vpop.permute.xlu0 %608 }
 0x22c   : > { %v617_v63 = vpop.permute.xlu1 %616  ;;  %v632_v60 = vadd.f32 %v609_v19, %v600_v43  ;;  %v2547_v19 = vlaneseq }
 0x22d   : > { %v636_v48 = vadd.f32 %v617_v63, %v604_v2  ;;  %v605_v2 = vadd.f32 %v587_v21, %v2005_v46  ;;  %v1509_v63 = vmov 12  }
 0x22e   : > { %v2312_v27 = vand.u32 127, %v2547_v19  ;;  %v680_v44 = vadd.f32 %v657_v0, %v632_v60  ;;  %1394 = vset.pattern.permute.xlu1 %v1509_v63  ;;  %1393 = vset.pattern.permute.xlu0 %v1509_v63 }
 0x22f   : > { %v637_v7 = vadd.f32 %v619_v4, %v605_v2  ;;  %1395 = vset.pattern.permute.xlu2 %v1509_v63 }
 0x230   : > { %vm834_vm9 = vcmp.eq.s32.totalorder %v2312_v27, 0  ;;  %vm963_vm10 = vcmp.eq.s32.totalorder %v2312_v27, 1  ;;  %vm1092_vm11 = vcmp.eq.s32.totalorder %v2312_v27, 14  ;;  %vm1157_vm12 = vcmp.eq.s32.totalorder %v2312_v27, 15 }
 0x233   : > { %v615_v5 = vpop.permute.xlu0 %614 }
 0x234   : > { %v623_v45 = vpop.permute.xlu1 %622  ;;  %v635_v23 = vadd.f32 %v615_v5, %v603_v59  ;;  %v2314_v59 = vpop.permute.xlu2 %696 }
 0x235   : > { %v639_v40 = vadd.f32 %v623_v45, %v607_v12 }
 0x236   : > { %v683_v12 = vadd.f32 %v663_v42, %v635_v23  ;;  %v1013_v42 = vadd.f32 %v2100_v57, %v2044_v49 }
 0x23b   : > { %v621_v30 = vpop.permute.xlu0 %620 }
 0x23c   : > { %v661_v62 = vpop.permute.xlu1 %660  ;;  %v638_v13 = vadd.f32 %v621_v30, %v606_v24 }
 0x23d   : > { %v682_v43 = vadd.f32 %v661_v62, %v634_v11 }
 0x23e   : > { %v686_v60 = vadd.f32 %v669_v39, %v638_v13  ;;  %v1012_v13 = vadd.f32 %v2116_v53, %v2051_v58 }
 0x243   : > { %v659_v25 = vpop.permute.xlu0 %658 }
 0x244   : > { %v667_v8 = vpop.permute.xlu1 %666  ;;  %v681_v5 = vadd.f32 %v659_v25, %v633_v52  ;;  %v2329_v52 = vpop.permute.xlu2 %702 }
 0x245   : > { %v685_v18 = vadd.f32 %v667_v8, %v637_v7 }
 0x246   : > { %v713_v1 = vadd.f32 %v691_v14, %v681_v5 }
 0x248   : > { %v876_v45 = vsel %vm834_vm9, %v2231_v22, %v713_v1 }
 0x249   : > { %v2323_v46 = vsel %vm963_vm10, %v972_v34, %v876_v45 }
 0x24b   : > { %v665_v4 = vpop.permute.xlu0 %664 }
 0x24c   : > { %v689_v41 = vpop.permute.xlu1 %688  ;;  %v2325_v6 = vadd.f32 %v665_v4, %v636_v48  ;;  %v1027_v0 = vpop.permute.xlu2 %1026  ;;  %v1015_v4 = vadd.f32 %v2133_v55, %v2061_v51 }
 0x24d   : > { %v2327_v21 = vadd.f32 %v689_v41, %v680_v44 }
 0x24e   : > { %v1047_v41 = vadd.f32 %v1027_v0, %v1015_v4  ;;  %v2548_v4 = vld [vmem:[#allocation8_spill] sm:$0xff] }
 0x253   : > { %v671_v10 = vpop.permute.xlu0 %670 }
 0x254   : > { %v695_v22 = vpop.permute.xlu1 %694  ;;  %v2331_v14 = vadd.f32 %v671_v10, %v639_v40  ;;  %v1033_v62 = vpop.permute.xlu2 %1032 }
 0x255   : > { %v2333_v34 = vadd.f32 %v695_v22, %v683_v12 }
 0x25b   : > { %v693_v24 = vpop.permute.xlu0 %692 }
 0x25c   : > { %v701_v48 = vpop.permute.xlu1 %700  ;;  %v2335_v11 = vadd.f32 %v693_v24, %v682_v43  ;;  %v1055_v23 = vpop.permute.xlu2 %1054  ;;  %v1044_v43 = vadd.f32 %v2270_v9, %v1012_v13  ;;  %v1014_v9 = vadd.f32 %v2141_v3, %v2030_v28  ;;  %v1017_v13 = vadd.f32 %v2150_v31, %v2035_v38 }
 0x25d   : > { %v2337_v30 = vadd.f32 %v701_v48, %v686_v60 }
 0x263   : > { %v699_v2 = vpop.permute.xlu0 %698 }
 0x264   : > { %v1025_v19 = vpop.permute.xlu1 %1024  ;;  %v2339_v7 = vadd.f32 %v699_v2, %v685_v18  ;;  %v1016_v2 = vadd.f32 %v2111_v47, %v2054_v50 }
 0x265   : > { %v1046_v24 = vadd.f32 %v1025_v19, %v1014_v9 }
 0x26b   : > { %v1023_v40 = vpop.permute.xlu0 %1022 }
 0x26c   : > { %v1031_v25 = vpop.permute.xlu1 %1030  ;;  %v1045_v8 = vadd.f32 %v1023_v40, %v1013_v42 }
 0x26e   : > { %v1077_v5 = vadd.f32 %v1055_v23, %v1045_v8  ;;  %v1061_v23 = vpop.permute.xlu2 %1060 }
 0x270   : > { %v1085_v39 = vadd.f32 %v1077_v5, %v2152_v61  ;;  %v1018_v61 = vadd.f32 %v2143_v17, %v2109_v16 }
 0x272   : > { %1100 = vperm.xlu1 %1394, %v1085_v39   ;;  %v1050_v60 = vadd.f32 %v1033_v62, %v1018_v61  ;;  %v1049_v62 = vadd.f32 %v1031_v25, %v1017_v13  ;;  %v1510_v61 = vmov 13   ;;  %v2552_v13 = vld [vmem:[#allocation11_spill] sm:$0xff] }
 0x273   : > { %v1029_v1 = vpop.permute.xlu0 %1028 }
 0x274   : > { %v1053_v45 = vpop.permute.xlu1 %1052  ;;  %v1048_v40 = vadd.f32 %v1029_v1, %v1016_v2  ;;  %v1147_v2 = vadd.f32 %v1050_v60, %v2143_v17 }
 0x275   : > { %v1076_v18 = vadd.f32 %v1053_v45, %v1044_v43  ;;  %v1142_v45 = vadd.f32 %v1045_v8, %v2100_v57  ;;  %v1141_v57 = vadd.f32 %v1044_v43, %v2116_v53  ;;  %v1144_v8 = vadd.f32 %v1047_v41, %v2133_v55 }
 0x276   : > { %v1080_v19 = vadd.f32 %v1061_v23, %v1048_v40 }
 0x277   : > { %v1084_v44 = vadd.f32 %v1076_v18, %v2161_v37  ;;  %v1019_v18 = vadd.f32 %v2129_v54, %v2122_v35 }
 0x278   : > { %v1088_v1 = vadd.f32 %v1080_v19, %v2548_v4  ;;  %v2553_v19 = vld [vmem:[#allocation15_spill] sm:$0xff] }
 0x279   : > { %1095 = vperm.xlu0 %1393, %v1084_v44  }
 0x27b   : > { %v1035_v63 = vpop.permute.xlu0 %1034 }
 0x27c   : > { %v1059_v12 = vpop.permute.xlu1 %1058 }
 0x27d   : > { %v1079_v10 = vadd.f32 %v1059_v12, %v1047_v41  ;;  %v1051_v12 = vadd.f32 %v1035_v63, %v1019_v18  ;;  %v1152_v63 = vadd.f32 %v1144_v8, %v2061_v51 }
 0x27f   : > { %v1087_v22 = vadd.f32 %v1079_v10, %v2170_v32 }
 0x281   : > { %1110 = vperm.xlu1 %1394, %v1087_v22   ;;  %v1150_v22 = vadd.f32 %v1142_v45, %v2044_v49  ;;  %v1143_v49 = vadd.f32 %v1046_v24, %v2141_v3  ;;  %v1148_v3 = vadd.f32 %v1051_v12, %v2129_v54  ;;  %v716_v54 = vadd.f32 %v2314_v59, %v2325_v6  ;;  %v2554_v45 = vld [vmem:[#allocation18_spill] sm:$0xff] }
 0x283   : > { %v1057_v37 = vpop.permute.xlu0 %1056  ;;  %v1151_v55 = vadd.f32 %v1143_v49, %v2030_v28 }
 0x284   : > { %v1065_v48 = vpop.permute.xlu1 %1064  ;;  %v1078_v0 = vadd.f32 %v1057_v37, %v1046_v24  ;;  %v1149_v37 = vadd.f32 %v1141_v57, %v2051_v58  ;;  %v1145_v58 = vadd.f32 %v1048_v40, %v2111_v47  ;;  %v2557_v57 = vld [vmem:[#allocation14_spill] sm:$0xff] }
 0x285   : > { %v1082_v42 = vadd.f32 %v1065_v48, %v1050_v60  ;;  %v1146_v48 = vadd.f32 %v1049_v62, %v2150_v31  ;;  %v1156_v31 = vadd.f32 %v1148_v3, %v2122_v35  ;;  %v881_v8 = vsel %vm834_vm9, %v2557_v57, %v2337_v30 }
 0x286   : > { %v1086_v32 = vadd.f32 %v1078_v0, %v2139_v36  ;;  %v2549_v36 = vld [vmem:[#allocation9_spill] sm:$0xff]  ;;  %v1153_v51 = vadd.f32 %v1145_v58, %v2054_v50 }
 0x287   : > { %v1090_v5 = vadd.f32 %v1082_v42, %v2226_v20  ;;  %v1067_v20 = vpop.permute.xlu2 %1066  ;;  %v1154_v53 = vadd.f32 %v1146_v48, %v2035_v38  ;;  %v719_v42 = vadd.f32 %v2329_v52, %v2331_v14  ;;  %v2551_v52 = vld [vmem:[#allocation10_spill] sm:$0xff] }
 0x288   : > { %1105 = vperm.xlu2 %1395, %v1086_v32   ;;  %v1083_v25 = vadd.f32 %v1067_v20, %v1051_v12  ;;  %v875_v14 = vsel %vm834_vm9, %v2551_v52, %v2327_v21 }
 0x289   : > { %1125 = vperm.xlu1 %1394, %v1090_v5  }
 0x28a   : > { %v1091_v9 = vadd.f32 %v1083_v25, %v2215_v29  ;;  %v1155_v29 = vadd.f32 %v1147_v2, %v2109_v16  ;;  %v2550_v16 = vld [vmem:[#allocation13_spill] sm:$0xff] }
 0x28b   : > { %v1063_v39 = vpop.permute.xlu0 %1062  ;;  %v877_v60 = vsel %vm834_vm9, %v2550_v16, %v2335_v11 }
 0x28c   : > { %v1081_v44 = vadd.f32 %v1063_v39, %v1049_v62  ;;  %v1006_v50 = vsel %vm963_vm10, %v2277_v56, %v877_v60  ;;  %v879_v56 = vsel %vm834_vm9, %v2240_v26, %v716_v54  ;;  %v878_v62 = vsel %vm834_vm9, %v2552_v13, %v2333_v34 }
 0x28d   : > { %v1008_v59 = vsel %vm963_vm10, %v2283_v33, %v879_v56  ;;  %v1004_v39 = vsel %vm963_vm10, %v2553_v19, %v875_v14 }
 0x28e   : > { %v1089_v10 = vadd.f32 %v1081_v44, %v2549_v36  ;;  %v2555_v44 = vld [vmem:[#allocation16_spill] sm:$0xff] }
 0x28f   : > { %v1007_v34 = vsel %vm963_vm10, %v2555_v44, %v878_v62 }
 0x290   : > { %1120 = vperm.xlu0 %1393, %v1089_v10   ;;  %1115 = vperm.xlu2 %1395, %v1088_v1  }
 0x291   : > { %1397 = vset.pattern.permute.xlu1 %v1510_v61 }
 0x292   : > { %1165 = vperm.xlu1 %1397, %v1150_v22  }
 0x298   : > { %1396 = vset.pattern.permute.xlu0 %v1510_v61  ;;  %1130 = vperm.xlu2 %1395, %v1091_v9   ;;  %v2558_v9 = vld [vmem:[#allocation17_spill] sm:$0xff] }
 0x299   : > { %1160 = vperm.xlu0 %1396, %v1149_v37  }
 0x29a   : > { %1175 = vperm.xlu1 %1397, %v1152_v63   ;;  %v2559_v63 = vld [vmem:[#allocation19_spill] sm:$0xff] }
 0x29b   : > { %v1010_v49 = vsel %vm963_vm10, %v2559_v63, %v881_v8 }
 0x2a0   : > { %1398 = vset.pattern.permute.xlu2 %v1510_v61  ;;  %v2556_v61 = vld [vmem:[#allocation12_spill] sm:$0xff] }
 0x2a1   : > { %1185 = vperm.xlu0 %1396, %v1154_v53   ;;  %1170 = vperm.xlu2 %1398, %v1151_v55   ;;  %v880_v25 = vsel %vm834_vm9, %v2556_v61, %v2339_v7 }
 0x2a2   : > { %1190 = vperm.xlu1 %1397, %v1155_v29   ;;  %v1009_v37 = vsel %vm963_vm10, %v2558_v9, %v880_v25 }
 0x2a9   : > { %1180 = vperm.xlu2 %1398, %v1153_v51  }
 0x2b1   : > { %1195 = vperm.xlu2 %1398, %v1156_v31  }
 0x2e2   : > { %v1106_v17 = vpop.permute.xlu2 %1105 }
 0x2e3   : > { %v1135_v24 = vsel %vm1092_vm11, %v1106_v17, %v1006_v50 }
 0x2e4   : > { %v1101_v38 = vpop.permute.xlu1 %1100 }
 0x2e5   : > { %v1134_v32 = vsel %vm1092_vm11, %v1101_v38, %v2323_v46  ;;  %v882_v46 = vsel %vm834_vm9, %v2219_v15, %v719_v42 }
 0x2e6   : > { %v1011_v18 = vsel %vm963_vm10, %v2554_v45, %v882_v46 }
 0x2ea   : > { %v1116_v28 = vpop.permute.xlu2 %1115 }
 0x2eb   : > { %v1096_v47 = vpop.permute.xlu0 %1095  ;;  %v1137_v23 = vsel %vm1092_vm11, %v1116_v28, %v1008_v59 }
 0x2ec   : > { %v1133_v21 = vsel %vm1092_vm11, %v1096_v47, %v1004_v39 }
 0x2f2   : > { %v1131_v43 = vpop.permute.xlu2 %1130 }
 0x2f3   : > { %v1111_v41 = vpop.permute.xlu1 %1110  ;;  %v1140_v15 = vsel %vm1092_vm11, %v1131_v43, %v1011_v18 }
 0x2f4   : > { %v1136_v12 = vsel %vm1092_vm11, %v1111_v41, %v1007_v34 }
 0x2fb   : > { %v1126_v35 = vpop.permute.xlu1 %1125  ;;  %v1171_v0 = vpop.permute.xlu2 %1170 }
 0x2fc   : > { %v1200_v11 = vsel %vm1157_vm12, %v1171_v0, %v1135_v24  ;;  %v1139_v2 = vsel %vm1092_vm11, %v1126_v35, %v1010_v49 }
 0x2fd   : > { %1209 = vst.msk [vmem:[%s2399_s3 + $0x10] sm:$0xff] %vm1206_vm13, %v1200_v11 }
 0x302   : > { %v1121_v6 = vpop.permute.xlu0 %1120 }
 0x303   : > { %v1181_v40 = vpop.permute.xlu2 %1180  ;;  %v1138_v7 = vsel %vm1092_vm11, %v1121_v6, %v1009_v37 }
 0x304   : > { %v1202_v26 = vsel %vm1157_vm12, %v1181_v40, %v1137_v23  ;;  %v1166_v5 = vpop.permute.xlu1 %1165 }
 0x305   : > { %1211 = vst.msk [vmem:[%s2399_s3 + $0x20] sm:$0xff] %vm1206_vm13, %v1202_v26  ;;  %v1199_v33 = vsel %vm1157_vm12, %v1166_v5, %v1134_v32 }
 0x306   : > { %1208 = vst.msk [vmem:[%s2399_s3 + $0x8] sm:$0xff] %vm1206_vm13, %v1199_v33 }
 0x30b   : > { %v1161_v4 = vpop.permute.xlu0 %1160  ;;  %v1196_v1 = vpop.permute.xlu2 %1195 }
 0x30c   : > { %v1198_v36 = vsel %vm1157_vm12, %v1161_v4, %v1133_v21  ;;  %v1205_v10 = vsel %vm1157_vm12, %v1196_v1, %v1140_v15  ;;  %v1176_v20 = vpop.permute.xlu1 %1175 }
 0x30d   : > { %1207 = vst.msk [vmem:[%s2399_s3] sm:$0xff] %vm1206_vm13, %v1198_v36  ;;  %v1201_v22 = vsel %vm1157_vm12, %v1176_v20, %v1136_v12 }
 0x30e   : > { %1214 = vst.msk [vmem:[%s2399_s3 + $0x38] sm:$0xff] %vm1206_vm13, %v1205_v10 }
 0x30f   : > { %1210 = vst.msk [vmem:[%s2399_s3 + $0x18] sm:$0xff] %vm1206_vm13, %v1201_v22 }
 0x313   : > { %v1186_v48 = vpop.permute.xlu0 %1185 }
 0x314   : > { %v1203_v30 = vsel %vm1157_vm12, %v1186_v48, %v1138_v7  ;;  %v1191_v53 = vpop.permute.xlu1 %1190 }
 0x315   : > { %1212 = vst.msk [vmem:[%s2399_s3 + $0x28] sm:$0xff] %vm1206_vm13, %v1203_v30  ;;  %v1204_v55 = vsel %vm1157_vm12, %v1191_v53, %v1139_v2 }
 0x316   : > { %1213 = vst.msk [vmem:[%s2399_s3 + $0x30] sm:$0xff] %vm1206_vm13, %v1204_v55 }
 0x317   : > { %1456 = shalt.err (!%p1453_p4)
}
 0x318   : > { %s1511_s21 = smov 128   ;;  %s1512_s27 = smov 8  }
 0x319   : > { %1327 = dma.vmem_to_hbm [thread:$0]  (%p1573_p11), %s2475_s13, 1024, %s1232_s14, %s1216_s16, %s1511_s21, %s1511_s21, %s1512_s27  }
 0x31a PF: > { %s1246_s28 = sand.u32 1, %s1483_s6   ;;  %p2560_p7 = scmp.ge.s32.totalorder %s1495_s9, 2 }
 0x31b   : > { %s1247_s29 = scalar_lea.sflag [#allocation4], %s1246_s28 }
 0x31c   : > { %p1334_p5 = pnand %p2560_p7, %p1577_p12 }
 0x31e   : > { %p1335_p8 = pneg %p1334_p5 }
 0x320   : > { %1478 = dma.done.wait (%p1335_p8), %s1247_s29, 1024  }
 0x321   : > { %1480 = vsyncadd (%p1335_p8), %s1247_s29, 4294966272  ;;  %p14_p10 = scmp.ge.s32.totalorder %s1548_s12, 4   ;;  %s2561_s6 = smov %s1487_s7 }
 0x322   : > { %s2562_s7 = smov %s1491_s8  ;;  %s2563_s8 = smov %s1560_s15 }
 0x323   : > { %s2564_s9 = smov %s1548_s12  ;;  %16 = sbr.rel (!%p14_p10) target bundleno = 5 (0x5), region = 69 }
 0x328   :  { %1253 = vsyncpa [#allocation3], 1 }
 0x329   :  { %1255 = vsyncpa [#allocation3 + $0x1], 1 }
 0x32a   :  { %1256 = vsyncpa [#allocation4], 1 }
 0x32b   :  { %1258 = vsyncpa [#allocation4 + $0x1], 1 }

</bundles_post_ra>
